<compile_context>
chip_gen: v5e
topology: v5e:2x2
jax: 0.10.0
libtpu: 0.0.40
codegen_flags: <defaults>
</compile_context>

<pallas_src>
import jax
import jax.numpy as jnp
from jax.experimental import pallas as pl
from jax.experimental.pallas import tpu as pltpu


def _round_up(x, m):
    return ((x + m - 1) // m) * m


# ----------------------------------------------------------------------------
# Pallas kernel: multi-layer LSTM over the full sequence + output projection.
# All weights are passed pre-transposed so the kernel does x @ W (MXU-friendly).
# ----------------------------------------------------------------------------
def _lstm_kernel(emb_ref,     # (S*Bp, E)    embedded inputs, time-major, batch-padded
                 wih0_ref,    # (E, 4H)      layer-0 input weights (transposed)
                 wihs_ref,    # (L-1, H, 4H) layer>=1 input weights (transposed)
                 whh_ref,     # (L, H, 4H)   recurrent weights (transposed)
                 bias_ref,    # (L, 1, 4H)   b_ih + b_hh per layer
                 wlin_ref,    # (H, Vp)      output linear weight (transposed, padded)
                 blin_ref,    # (1, Vp)      output linear bias (padded)
                 out_ref,     # (S*Bp, Vp)   logits, time-major, lane-dense
                 hout_ref,    # (L, Bp, H)   final hidden state
                 cout_ref):   # (L, Bp, H)   final cell state
    L, Bp, H = hout_ref.shape
    S = emb_ref.shape[0] // Bp

    x = emb_ref[...]                                     # layer input, (S*Bp, in)
    for l in range(L):                                   # static unroll over layers
        w_ih = wih0_ref[...] if l == 0 else wihs_ref[l - 1]
        # Input contribution for ALL timesteps: one batched MXU matmul,
        # removed from the recurrent critical path.
        gi = jnp.dot(x, w_ih, preferred_element_type=jnp.float32)    # (S*Bp, 4H)
        w_hh = whh_ref[l]                                # (H, 4H) hoisted load
        b = jnp.broadcast_to(bias_ref[l], (Bp, 4 * H))   # hoisted broadcast

        h = jnp.zeros((Bp, H), jnp.float32)
        c = jnp.zeros((Bp, H), jnp.float32)
        hs = []
        for t in range(S):                               # static unroll: serial part
            gates = (gi[t * Bp:(t + 1) * Bp, :]          # aligned 8-sublane slice
                     + jnp.dot(h, w_hh, preferred_element_type=jnp.float32)
                     + b)                                # (Bp, 4H)
            # Two full-vreg EUP ops instead of four quarter-vreg ones, then
            # static lane slices (PyTorch gate order: i, f, g, o).
            sig = jax.nn.sigmoid(gates)
            th = jnp.tanh(gates)
            i_g = sig[:, 0 * H:1 * H]
            f_g = sig[:, 1 * H:2 * H]
            g_g = th[:, 2 * H:3 * H]
            o_g = sig[:, 3 * H:4 * H]
            c = f_g * c + i_g * g_g
            h = o_g * jnp.tanh(c)
            hs.append(h)
        hout_ref[l] = h
        cout_ref[l] = c
        x = jnp.concatenate(hs, axis=0)                  # (S*Bp, H) -> next layer

    # Output projection hoisted out of the recurrence: one batched matmul,
    # one lane-dense (multiple-of-128) store.
    out_ref[...] = (jnp.dot(x, wlin_ref[...], preferred_element_type=jnp.float32)
                    + blin_ref[...])


# ----------------------------------------------------------------------------
# Parameter construction (deterministic, PyTorch-like init, pre-transposed)
# ----------------------------------------------------------------------------
def init_params(key, voc_size, emb_size, hidden, num_layers):
    assert num_layers >= 2
    keys = list(jax.random.split(key, 8 + 4 * num_layers))
    pop = lambda: keys.pop()
    std = 1.0 / (hidden ** 0.5)
    u = lambda shape: jax.random.uniform(pop(), shape, jnp.float32, -std, std)

    embedding = jax.random.normal(pop(), (voc_size, emb_size), jnp.float32)

    # layer 0 input weights (4H, E) -> transpose to (E, 4H)
    wih0 = u((4 * hidden, emb_size)).T
    # layers 1..L-1 input weights (4H, H) -> (L-1, H, 4H)
    wihs = jnp.stack([u((4 * hidden, hidden)).T for _ in range(num_layers - 1)])
    # recurrent weights (4H, H) -> (L, H, 4H)
    whh = jnp.stack([u((4 * hidden, hidden)).T for _ in range(num_layers)])
    # bias = b_ih + b_hh, shaped (L, 1, 4H) for in-kernel broadcast
    bias = jnp.stack([(u((4 * hidden,)) + u((4 * hidden,))).reshape(1, 4 * hidden)
                      for _ in range(num_layers)])
    # output linear (V, H) -> (H, V), bias (V,) -> (1, V)
    wlin = u((voc_size, hidden)).T
    blin = u((voc_size,)).reshape(1, voc_size)

    return dict(embedding=embedding, wih0=wih0, wihs=wihs, whh=whh,
                bias=bias, wlin=wlin, blin=blin)


# ----------------------------------------------------------------------------
# Forward pass (mirrors RNN.forward)
# ----------------------------------------------------------------------------
def rnn_forward(input_ids, p):
    B, S = input_ids.shape
    V, E = p["embedding"].shape
    L = p["whh"].shape[0]
    H = p["whh"].shape[1]

    Bp = _round_up(max(B, 8), 8)       # sublane-pad batch (f32 sublane = 8)
    Vp = _round_up(V, 128)             # lane-pad vocab for a lane-dense store

    # embedding lookup (glue: simple gather), then time-major + batch pad
    embedded = jnp.take(p["embedding"], input_ids, axis=0)            # (B, S, E)
    emb_tm = jnp.transpose(embedded, (1, 0, 2)).astype(jnp.float32)   # (S, B, E)
    emb_tm = jnp.pad(emb_tm, ((0, 0), (0, Bp - B), (0, 0)))           # (S, Bp, E)
    emb_flat = emb_tm.reshape(S * Bp, E)

    wlin_p = jnp.pad(p["wlin"], ((0, 0), (0, Vp - V)))                # (H, Vp)
    blin_p = jnp.pad(p["blin"], ((0, 0), (0, Vp - V)))                # (1, Vp)

    inputs = (emb_flat, p["wih0"], p["wihs"], p["whh"], p["bias"],
              wlin_p, blin_p)

    def full_spec(x):
        return pl.BlockSpec(x.shape, lambda i, n=x.ndim: (0,) * n)

    out_shapes = (jax.ShapeDtypeStruct((S * Bp, Vp), jnp.float32),
                  jax.ShapeDtypeStruct((L, Bp, H), jnp.float32),
                  jax.ShapeDtypeStruct((L, Bp, H), jnp.float32))
    out_specs = tuple(pl.BlockSpec(s.shape, lambda i, n=len(s.shape): (0,) * n)
                      for s in out_shapes)

    out_flat, h_pad, c_pad = pl.pallas_call(
        _lstm_kernel,
        out_shape=out_shapes,
        grid=(1,),
        in_specs=[full_spec(x) for x in inputs],
        out_specs=out_specs,
        compiler_params=pltpu.CompilerParams(
            dimension_semantics=("arbitrary",)),
    )(*inputs)

    # un-pad and return to PyTorch's batch-first layout (tiny tensor at toy V)
    out = out_flat.reshape(S, Bp, Vp)[:, :B, :V]
    output_data = jnp.transpose(out, (1, 0, 2))                       # (B, S, V)
    h_n = h_pad[:, :B, :]
    c_n = c_pad[:, :B, :]
    return output_data, None, (h_n, c_n)


# ----------------------------------------------------------------------------
# Pure-JAX reference (same math) for a correctness check
# ----------------------------------------------------------------------------
def rnn_forward_ref(input_ids, p):
    B, S = input_ids.shape
    V, E = p["embedding"].shape
    L = p["whh"].shape[0]
    H = p["whh"].shape[1]
    embedded = jnp.take(p["embedding"], input_ids, axis=0)            # (B, S, E)
    h = jnp.zeros((L, B, H), jnp.float32)
    c = jnp.zeros((L, B, H), jnp.float32)
    outs = []
    for t in range(S):
        x = embedded[:, t, :]
        hs, cs = [], []
        for l in range(L):
            w_ih = p["wih0"] if l == 0 else p["wihs"][l - 1]
            gates = x @ w_ih + h[l] @ p["whh"][l] + p["bias"][l]
            i_g = jax.nn.sigmoid(gates[:, :H])
            f_g = jax.nn.sigmoid(gates[:, H:2 * H])
            g_g = jnp.tanh(gates[:, 2 * H:3 * H])
            o_g = jax.nn.sigmoid(gates[:, 3 * H:])
            c_new = f_g * c[l] + i_g * g_g
            h_new = o_g * jnp.tanh(c_new)
            hs.append(h_new)
            cs.append(c_new)
            x = h_new
        h = jnp.stack(hs)
        c = jnp.stack(cs)
        outs.append(x @ p["wlin"] + p["blin"])
    out = jnp.stack(outs, axis=1)                                      # (B, S, V)
    return out, h, c


if __name__ == "__main__":
    # Small shapes consistent with the module: vocab=20, embed=16, hidden=32,
    # num_layers=3, batch=2, seq=8.
    V, E, H, L, B, S = 20, 16, 32, 3, 2, 8
    key = jax.random.PRNGKey(0)
    params = init_params(key, V, E, H, L)

    ids_key = jax.random.fold_in(key, 123)
    input_ids = jax.random.randint(ids_key, (B, S), 0, V, dtype=jnp.int32)

    out, _, (h_n, c_n) = rnn_forward(input_ids, params)
    jax.block_until_ready(out)
    jax.block_until_ready(h_n)
    jax.block_until_ready(c_n)

    ref_out, ref_h, ref_c = rnn_forward_ref(input_ids, params)
    assert out.shape == (B, S, V) and h_n.shape == (L, B, H) and c_n.shape == (L, B, H)
    assert jnp.allclose(out, ref_out, rtol=1e-4, atol=1e-4)
    assert jnp.allclose(h_n, ref_h, rtol=1e-4, atol=1e-4)
    assert jnp.allclose(c_n, ref_c, rtol=1e-4, atol=1e-4)

    print("KERNEL_OK")
</pallas_src>

<mosaic_0001>
module attributes {stable_mosaic.version = 11 : i64} {
  func.func @_lstm_kernel(%arg0: i32, %arg1: memref<64x16xf32, #tpu.memory_space<vmem>>, %arg2: memref<16x128xf32, #tpu.memory_space<vmem>>, %arg3: memref<2x32x128xf32, #tpu.memory_space<vmem>>, %arg4: memref<3x32x128xf32, #tpu.memory_space<vmem>>, %arg5: memref<3x1x128xf32, #tpu.memory_space<vmem>>, %arg6: memref<32x128xf32, #tpu.memory_space<vmem>>, %arg7: memref<1x128xf32, #tpu.memory_space<vmem>>, %arg8: memref<64x128xf32, #tpu.memory_space<vmem>>, %arg9: memref<3x8x32xf32, #tpu.memory_space<vmem>>, %arg10: memref<3x8x32xf32, #tpu.memory_space<vmem>>) attributes {dimension_semantics = [#tpu.dimension_semantics<arbitrary>], iteration_bounds = array<i64: 1>, scalar_prefetch = 0 : i64, scratch_operands = 0 : i64, tpu.core_type = #tpu.core_type<tc>, window_params = [{pipeline_mode = #tpu.pipeline_mode<synchronous>, transform_indices = @transform_0, window_bounds = array<i64: 64, 16>}, {pipeline_mode = #tpu.pipeline_mode<synchronous>, transform_indices = @transform_1, window_bounds = array<i64: 16, 128>}, {pipeline_mode = #tpu.pipeline_mode<synchronous>, transform_indices = @transform_2, window_bounds = array<i64: 2, 32, 128>}, {pipeline_mode = #tpu.pipeline_mode<synchronous>, transform_indices = @transform_3, window_bounds = array<i64: 3, 32, 128>}, {pipeline_mode = #tpu.pipeline_mode<synchronous>, transform_indices = @transform_4, window_bounds = array<i64: 3, 1, 128>}, {pipeline_mode = #tpu.pipeline_mode<synchronous>, transform_indices = @transform_5, window_bounds = array<i64: 32, 128>}, {pipeline_mode = #tpu.pipeline_mode<synchronous>, transform_indices = @transform_6, window_bounds = array<i64: 1, 128>}, {pipeline_mode = #tpu.pipeline_mode<synchronous>, transform_indices = @transform_7, window_bounds = array<i64: 64, 128>}, {pipeline_mode = #tpu.pipeline_mode<synchronous>, transform_indices = @transform_8, window_bounds = array<i64: 3, 8, 32>}, {pipeline_mode = #tpu.pipeline_mode<synchronous>, transform_indices = @transform_9, window_bounds = array<i64: 3, 8, 32>}]} {
    %c0 = arith.constant 0 : index
    %c0_0 = arith.constant 0 : index
    %0 = vector.load %arg1[%c0, %c0_0] : memref<64x16xf32, #tpu.memory_space<vmem>>, vector<64x16xf32>
    %c0_1 = arith.constant 0 : index
    %c0_2 = arith.constant 0 : index
    %1 = vector.load %arg2[%c0_1, %c0_2] : memref<16x128xf32, #tpu.memory_space<vmem>>, vector<16x128xf32>
    %cst = arith.constant dense<0.000000e+00> : vector<64x128xf32>
    %2 = tpu.matmul %0, %1, %cst {dimension_numbers = #tpu.dot_dimension_numbers<[1], [0], [0], [1], [0, 0, 1, 1], [], []>} : vector<64x16xf32>, vector<16x128xf32>, vector<64x128xf32> -> vector<64x128xf32>
    %c0_3 = arith.constant 0 : index
    %c0_4 = arith.constant 0 : index
    %c0_5 = arith.constant 0 : index
    %3 = vector.load %arg4[%c0_3, %c0_4, %c0_5] : memref<3x32x128xf32, #tpu.memory_space<vmem>>, vector<1x32x128xf32>
    %4 = vector.shape_cast %3 : vector<1x32x128xf32> to vector<32x128xf32>
    %c0_6 = arith.constant 0 : index
    %c0_7 = arith.constant 0 : index
    %c0_8 = arith.constant 0 : index
    %5 = vector.load %arg5[%c0_6, %c0_7, %c0_8] : memref<3x1x128xf32, #tpu.memory_space<vmem>>, vector<1x1x128xf32>
    %6 = vector.shape_cast %5 : vector<1x1x128xf32> to vector<1x128xf32>
    %7 = vector.shape_cast %6 : vector<1x128xf32> to vector<1x128xf32>
    %8 = vector.broadcast %7 : vector<1x128xf32> to vector<8x128xf32>
    %cst_9 = arith.constant 0.000000e+00 : f32
    %9 = vector.broadcast %cst_9 : f32 to vector<8x32xf32>
    %cst_10 = arith.constant 0.000000e+00 : f32
    %10 = vector.broadcast %cst_10 : f32 to vector<8x32xf32>
    %11 = vector.extract_strided_slice %2 {offsets = [0, 0], sizes = [8, 128], strides = [1, 1]} : vector<64x128xf32> to vector<8x128xf32>
    %cst_11 = arith.constant dense<0.000000e+00> : vector<8x128xf32>
    %12 = tpu.matmul %9, %4, %cst_11 {dimension_numbers = #tpu.dot_dimension_numbers<[1], [0], [0], [1], [0, 0, 1, 1], [], []>} : vector<8x32xf32>, vector<32x128xf32>, vector<8x128xf32> -> vector<8x128xf32>
    %13 = arith.addf %11, %12 : vector<8x128xf32>
    %14 = arith.addf %13, %8 : vector<8x128xf32>
    %15 = arith.negf %14 : vector<8x128xf32>
    %16 = math.exp %15 : vector<8x128xf32>
    %cst_12 = arith.constant 1.000000e+00 : f32
    %17 = vector.broadcast %cst_12 : f32 to vector<8x128xf32>
    %18 = arith.addf %17, %16 : vector<8x128xf32>
    %19 = arith.divf %17, %18 : vector<8x128xf32>
    %20 = math.tanh %14 : vector<8x128xf32>
    %21 = vector.extract_strided_slice %19 {offsets = [0, 0], sizes = [8, 32], strides = [1, 1]} : vector<8x128xf32> to vector<8x32xf32>
    %22 = vector.extract_strided_slice %19 {offsets = [0, 32], sizes = [8, 32], strides = [1, 1]} : vector<8x128xf32> to vector<8x32xf32>
    %23 = vector.extract_strided_slice %20 {offsets = [0, 64], sizes = [8, 32], strides = [1, 1]} : vector<8x128xf32> to vector<8x32xf32>
    %24 = vector.extract_strided_slice %19 {offsets = [0, 96], sizes = [8, 32], strides = [1, 1]} : vector<8x128xf32> to vector<8x32xf32>
    %25 = arith.mulf %22, %10 : vector<8x32xf32>
    %26 = arith.mulf %21, %23 : vector<8x32xf32>
    %27 = arith.addf %25, %26 : vector<8x32xf32>
    %28 = math.tanh %27 : vector<8x32xf32>
    %29 = arith.mulf %24, %28 : vector<8x32xf32>
    %30 = vector.extract_strided_slice %2 {offsets = [8, 0], sizes = [8, 128], strides = [1, 1]} : vector<64x128xf32> to vector<8x128xf32>
    %cst_13 = arith.constant dense<0.000000e+00> : vector<8x128xf32>
    %31 = tpu.matmul %29, %4, %cst_13 {dimension_numbers = #tpu.dot_dimension_numbers<[1], [0], [0], [1], [0, 0, 1, 1], [], []>} : vector<8x32xf32>, vector<32x128xf32>, vector<8x128xf32> -> vector<8x128xf32>
    %32 = arith.addf %30, %31 : vector<8x128xf32>
    %33 = arith.addf %32, %8 : vector<8x128xf32>
    %34 = arith.negf %33 : vector<8x128xf32>
    %35 = math.exp %34 : vector<8x128xf32>
    %cst_14 = arith.constant 1.000000e+00 : f32
    %36 = vector.broadcast %cst_14 : f32 to vector<8x128xf32>
    %37 = arith.addf %36, %35 : vector<8x128xf32>
    %38 = arith.divf %36, %37 : vector<8x128xf32>
    %39 = math.tanh %33 : vector<8x128xf32>
    %40 = vector.extract_strided_slice %38 {offsets = [0, 0], sizes = [8, 32], strides = [1, 1]} : vector<8x128xf32> to vector<8x32xf32>
    %41 = vector.extract_strided_slice %38 {offsets = [0, 32], sizes = [8, 32], strides = [1, 1]} : vector<8x128xf32> to vector<8x32xf32>
    %42 = vector.extract_strided_slice %39 {offsets = [0, 64], sizes = [8, 32], strides = [1, 1]} : vector<8x128xf32> to vector<8x32xf32>
    %43 = vector.extract_strided_slice %38 {offsets = [0, 96], sizes = [8, 32], strides = [1, 1]} : vector<8x128xf32> to vector<8x32xf32>
    %44 = arith.mulf %41, %27 : vector<8x32xf32>
    %45 = arith.mulf %40, %42 : vector<8x32xf32>
    %46 = arith.addf %44, %45 : vector<8x32xf32>
    %47 = math.tanh %46 : vector<8x32xf32>
    %48 = arith.mulf %43, %47 : vector<8x32xf32>
    %49 = vector.extract_strided_slice %2 {offsets = [16, 0], sizes = [8, 128], strides = [1, 1]} : vector<64x128xf32> to vector<8x128xf32>
    %cst_15 = arith.constant dense<0.000000e+00> : vector<8x128xf32>
    %50 = tpu.matmul %48, %4, %cst_15 {dimension_numbers = #tpu.dot_dimension_numbers<[1], [0], [0], [1], [0, 0, 1, 1], [], []>} : vector<8x32xf32>, vector<32x128xf32>, vector<8x128xf32> -> vector<8x128xf32>
    %51 = arith.addf %49, %50 : vector<8x128xf32>
    %52 = arith.addf %51, %8 : vector<8x128xf32>
    %53 = arith.negf %52 : vector<8x128xf32>
    %54 = math.exp %53 : vector<8x128xf32>
    %cst_16 = arith.constant 1.000000e+00 : f32
    %55 = vector.broadcast %cst_16 : f32 to vector<8x128xf32>
    %56 = arith.addf %55, %54 : vector<8x128xf32>
    %57 = arith.divf %55, %56 : vector<8x128xf32>
    %58 = math.tanh %52 : vector<8x128xf32>
    %59 = vector.extract_strided_slice %57 {offsets = [0, 0], sizes = [8, 32], strides = [1, 1]} : vector<8x128xf32> to vector<8x32xf32>
    %60 = vector.extract_strided_slice %57 {offsets = [0, 32], sizes = [8, 32], strides = [1, 1]} : vector<8x128xf32> to vector<8x32xf32>
    %61 = vector.extract_strided_slice %58 {offsets = [0, 64], sizes = [8, 32], strides = [1, 1]} : vector<8x128xf32> to vector<8x32xf32>
    %62 = vector.extract_strided_slice %57 {offsets = [0, 96], sizes = [8, 32], strides = [1, 1]} : vector<8x128xf32> to vector<8x32xf32>
    %63 = arith.mulf %60, %46 : vector<8x32xf32>
    %64 = arith.mulf %59, %61 : vector<8x32xf32>
    %65 = arith.addf %63, %64 : vector<8x32xf32>
    %66 = math.tanh %65 : vector<8x32xf32>
    %67 = arith.mulf %62, %66 : vector<8x32xf32>
    %68 = vector.extract_strided_slice %2 {offsets = [24, 0], sizes = [8, 128], strides = [1, 1]} : vector<64x128xf32> to vector<8x128xf32>
    %cst_17 = arith.constant dense<0.000000e+00> : vector<8x128xf32>
    %69 = tpu.matmul %67, %4, %cst_17 {dimension_numbers = #tpu.dot_dimension_numbers<[1], [0], [0], [1], [0, 0, 1, 1], [], []>} : vector<8x32xf32>, vector<32x128xf32>, vector<8x128xf32> -> vector<8x128xf32>
    %70 = arith.addf %68, %69 : vector<8x128xf32>
    %71 = arith.addf %70, %8 : vector<8x128xf32>
    %72 = arith.negf %71 : vector<8x128xf32>
    %73 = math.exp %72 : vector<8x128xf32>
    %cst_18 = arith.constant 1.000000e+00 : f32
    %74 = vector.broadcast %cst_18 : f32 to vector<8x128xf32>
    %75 = arith.addf %74, %73 : vector<8x128xf32>
    %76 = arith.divf %74, %75 : vector<8x128xf32>
    %77 = math.tanh %71 : vector<8x128xf32>
    %78 = vector.extract_strided_slice %76 {offsets = [0, 0], sizes = [8, 32], strides = [1, 1]} : vector<8x128xf32> to vector<8x32xf32>
    %79 = vector.extract_strided_slice %76 {offsets = [0, 32], sizes = [8, 32], strides = [1, 1]} : vector<8x128xf32> to vector<8x32xf32>
    %80 = vector.extract_strided_slice %77 {offsets = [0, 64], sizes = [8, 32], strides = [1, 1]} : vector<8x128xf32> to vector<8x32xf32>
    %81 = vector.extract_strided_slice %76 {offsets = [0, 96], sizes = [8, 32], strides = [1, 1]} : vector<8x128xf32> to vector<8x32xf32>
    %82 = arith.mulf %79, %65 : vector<8x32xf32>
    %83 = arith.mulf %78, %80 : vector<8x32xf32>
    %84 = arith.addf %82, %83 : vector<8x32xf32>
    %85 = math.tanh %84 : vector<8x32xf32>
    %86 = arith.mulf %81, %85 : vector<8x32xf32>
    %87 = vector.extract_strided_slice %2 {offsets = [32, 0], sizes = [8, 128], strides = [1, 1]} : vector<64x128xf32> to vector<8x128xf32>
    %cst_19 = arith.constant dense<0.000000e+00> : vector<8x128xf32>
    %88 = tpu.matmul %86, %4, %cst_19 {dimension_numbers = #tpu.dot_dimension_numbers<[1], [0], [0], [1], [0, 0, 1, 1], [], []>} : vector<8x32xf32>, vector<32x128xf32>, vector<8x128xf32> -> vector<8x128xf32>
    %89 = arith.addf %87, %88 : vector<8x128xf32>
    %90 = arith.addf %89, %8 : vector<8x128xf32>
    %91 = arith.negf %90 : vector<8x128xf32>
    %92 = math.exp %91 : vector<8x128xf32>
    %cst_20 = arith.constant 1.000000e+00 : f32
    %93 = vector.broadcast %cst_20 : f32 to vector<8x128xf32>
    %94 = arith.addf %93, %92 : vector<8x128xf32>
    %95 = arith.divf %93, %94 : vector<8x128xf32>
    %96 = math.tanh %90 : vector<8x128xf32>
    %97 = vector.extract_strided_slice %95 {offsets = [0, 0], sizes = [8, 32], strides = [1, 1]} : vector<8x128xf32> to vector<8x32xf32>
    %98 = vector.extract_strided_slice %95 {offsets = [0, 32], sizes = [8, 32], strides = [1, 1]} : vector<8x128xf32> to vector<8x32xf32>
    %99 = vector.extract_strided_slice %96 {offsets = [0, 64], sizes = [8, 32], strides = [1, 1]} : vector<8x128xf32> to vector<8x32xf32>
    %100 = vector.extract_strided_slice %95 {offsets = [0, 96], sizes = [8, 32], strides = [1, 1]} : vector<8x128xf32> to vector<8x32xf32>
    %101 = arith.mulf %98, %84 : vector<8x32xf32>
    %102 = arith.mulf %97, %99 : vector<8x32xf32>
    %103 = arith.addf %101, %102 : vector<8x32xf32>
    %104 = math.tanh %103 : vector<8x32xf32>
    %105 = arith.mulf %100, %104 : vector<8x32xf32>
    %106 = vector.extract_strided_slice %2 {offsets = [40, 0], sizes = [8, 128], strides = [1, 1]} : vector<64x128xf32> to vector<8x128xf32>
    %cst_21 = arith.constant dense<0.000000e+00> : vector<8x128xf32>
    %107 = tpu.matmul %105, %4, %cst_21 {dimension_numbers = #tpu.dot_dimension_numbers<[1], [0], [0], [1], [0, 0, 1, 1], [], []>} : vector<8x32xf32>, vector<32x128xf32>, vector<8x128xf32> -> vector<8x128xf32>
    %108 = arith.addf %106, %107 : vector<8x128xf32>
    %109 = arith.addf %108, %8 : vector<8x128xf32>
    %110 = arith.negf %109 : vector<8x128xf32>
    %111 = math.exp %110 : vector<8x128xf32>
    %cst_22 = arith.constant 1.000000e+00 : f32
    %112 = vector.broadcast %cst_22 : f32 to vector<8x128xf32>
    %113 = arith.addf %112, %111 : vector<8x128xf32>
    %114 = arith.divf %112, %113 : vector<8x128xf32>
    %115 = math.tanh %109 : vector<8x128xf32>
    %116 = vector.extract_strided_slice %114 {offsets = [0, 0], sizes = [8, 32], strides = [1, 1]} : vector<8x128xf32> to vector<8x32xf32>
    %117 = vector.extract_strided_slice %114 {offsets = [0, 32], sizes = [8, 32], strides = [1, 1]} : vector<8x128xf32> to vector<8x32xf32>
    %118 = vector.extract_strided_slice %115 {offsets = [0, 64], sizes = [8, 32], strides = [1, 1]} : vector<8x128xf32> to vector<8x32xf32>
    %119 = vector.extract_strided_slice %114 {offsets = [0, 96], sizes = [8, 32], strides = [1, 1]} : vector<8x128xf32> to vector<8x32xf32>
    %120 = arith.mulf %117, %103 : vector<8x32xf32>
    %121 = arith.mulf %116, %118 : vector<8x32xf32>
    %122 = arith.addf %120, %121 : vector<8x32xf32>
    %123 = math.tanh %122 : vector<8x32xf32>
    %124 = arith.mulf %119, %123 : vector<8x32xf32>
    %125 = vector.extract_strided_slice %2 {offsets = [48, 0], sizes = [8, 128], strides = [1, 1]} : vector<64x128xf32> to vector<8x128xf32>
    %cst_23 = arith.constant dense<0.000000e+00> : vector<8x128xf32>
    %126 = tpu.matmul %124, %4, %cst_23 {dimension_numbers = #tpu.dot_dimension_numbers<[1], [0], [0], [1], [0, 0, 1, 1], [], []>} : vector<8x32xf32>, vector<32x128xf32>, vector<8x128xf32> -> vector<8x128xf32>
    %127 = arith.addf %125, %126 : vector<8x128xf32>
    %128 = arith.addf %127, %8 : vector<8x128xf32>
    %129 = arith.negf %128 : vector<8x128xf32>
    %130 = math.exp %129 : vector<8x128xf32>
    %cst_24 = arith.constant 1.000000e+00 : f32
    %131 = vector.broadcast %cst_24 : f32 to vector<8x128xf32>
    %132 = arith.addf %131, %130 : vector<8x128xf32>
    %133 = arith.divf %131, %132 : vector<8x128xf32>
    %134 = math.tanh %128 : vector<8x128xf32>
    %135 = vector.extract_strided_slice %133 {offsets = [0, 0], sizes = [8, 32], strides = [1, 1]} : vector<8x128xf32> to vector<8x32xf32>
    %136 = vector.extract_strided_slice %133 {offsets = [0, 32], sizes = [8, 32], strides = [1, 1]} : vector<8x128xf32> to vector<8x32xf32>
    %137 = vector.extract_strided_slice %134 {offsets = [0, 64], sizes = [8, 32], strides = [1, 1]} : vector<8x128xf32> to vector<8x32xf32>
    %138 = vector.extract_strided_slice %133 {offsets = [0, 96], sizes = [8, 32], strides = [1, 1]} : vector<8x128xf32> to vector<8x32xf32>
    %139 = arith.mulf %136, %122 : vector<8x32xf32>
    %140 = arith.mulf %135, %137 : vector<8x32xf32>
    %141 = arith.addf %139, %140 : vector<8x32xf32>
    %142 = math.tanh %141 : vector<8x32xf32>
    %143 = arith.mulf %138, %142 : vector<8x32xf32>
    %144 = vector.extract_strided_slice %2 {offsets = [56, 0], sizes = [8, 128], strides = [1, 1]} : vector<64x128xf32> to vector<8x128xf32>
    %cst_25 = arith.constant dense<0.000000e+00> : vector<8x128xf32>
    %145 = tpu.matmul %143, %4, %cst_25 {dimension_numbers = #tpu.dot_dimension_numbers<[1], [0], [0], [1], [0, 0, 1, 1], [], []>} : vector<8x32xf32>, vector<32x128xf32>, vector<8x128xf32> -> vector<8x128xf32>
    %146 = arith.addf %144, %145 : vector<8x128xf32>
    %147 = arith.addf %146, %8 : vector<8x128xf32>
    %148 = arith.negf %147 : vector<8x128xf32>
    %149 = math.exp %148 : vector<8x128xf32>
    %cst_26 = arith.constant 1.000000e+00 : f32
    %150 = vector.broadcast %cst_26 : f32 to vector<8x128xf32>
    %151 = arith.addf %150, %149 : vector<8x128xf32>
    %152 = arith.divf %150, %151 : vector<8x128xf32>
    %153 = math.tanh %147 : vector<8x128xf32>
    %154 = vector.extract_strided_slice %152 {offsets = [0, 0], sizes = [8, 32], strides = [1, 1]} : vector<8x128xf32> to vector<8x32xf32>
    %155 = vector.extract_strided_slice %152 {offsets = [0, 32], sizes = [8, 32], strides = [1, 1]} : vector<8x128xf32> to vector<8x32xf32>
    %156 = vector.extract_strided_slice %153 {offsets = [0, 64], sizes = [8, 32], strides = [1, 1]} : vector<8x128xf32> to vector<8x32xf32>
    %157 = vector.extract_strided_slice %152 {offsets = [0, 96], sizes = [8, 32], strides = [1, 1]} : vector<8x128xf32> to vector<8x32xf32>
    %158 = arith.mulf %155, %141 : vector<8x32xf32>
    %159 = arith.mulf %154, %156 : vector<8x32xf32>
    %160 = arith.addf %158, %159 : vector<8x32xf32>
    %161 = math.tanh %160 : vector<8x32xf32>
    %162 = arith.mulf %157, %161 : vector<8x32xf32>
    %c0_27 = arith.constant 0 : index
    %c0_28 = arith.constant 0 : index
    %c0_29 = arith.constant 0 : index
    %163 = vector.load %arg9[%c0_27, %c0_28, %c0_29] : memref<3x8x32xf32, #tpu.memory_space<vmem>>, vector<1x8x32xf32>
    %164 = vector.shape_cast %163 : vector<1x8x32xf32> to vector<8x32xf32>
    %165 = vector.shape_cast %162 : vector<8x32xf32> to vector<1x8x32xf32>
    tpu.vector_store %arg9[%c0_27, %c0_28, %c0_29], %165 {strides = array<i32>} : memref<3x8x32xf32, #tpu.memory_space<vmem>>, vector<1x8x32xf32>,
    %c0_30 = arith.constant 0 : index
    %c0_31 = arith.constant 0 : index
    %c0_32 = arith.constant 0 : index
    %166 = vector.load %arg10[%c0_30, %c0_31, %c0_32] : memref<3x8x32xf32, #tpu.memory_space<vmem>>, vector<1x8x32xf32>
    %167 = vector.shape_cast %166 : vector<1x8x32xf32> to vector<8x32xf32>
    %168 = vector.shape_cast %160 : vector<8x32xf32> to vector<1x8x32xf32>
    tpu.vector_store %arg10[%c0_30, %c0_31, %c0_32], %168 {strides = array<i32>} : memref<3x8x32xf32, #tpu.memory_space<vmem>>, vector<1x8x32xf32>,
    %169 = tpu.concatenate %29, %48, %67, %86, %105, %124, %143, %162 in 0 : vector<8x32xf32>, vector<8x32xf32>, vector<8x32xf32>, vector<8x32xf32>, vector<8x32xf32>, vector<8x32xf32>, vector<8x32xf32>, vector<8x32xf32> -> vector<64x32xf32>
    %c0_33 = arith.constant 0 : index
    %c0_34 = arith.constant 0 : index
    %c0_35 = arith.constant 0 : index
    %170 = vector.load %arg3[%c0_33, %c0_34, %c0_35] : memref<2x32x128xf32, #tpu.memory_space<vmem>>, vector<1x32x128xf32>
    %171 = vector.shape_cast %170 : vector<1x32x128xf32> to vector<32x128xf32>
    %cst_36 = arith.constant dense<0.000000e+00> : vector<64x128xf32>
    %172 = tpu.matmul %169, %171, %cst_36 {dimension_numbers = #tpu.dot_dimension_numbers<[1], [0], [0], [1], [0, 0, 1, 1], [], []>} : vector<64x32xf32>, vector<32x128xf32>, vector<64x128xf32> -> vector<64x128xf32>
    %c1 = arith.constant 1 : index
    %c0_37 = arith.constant 0 : index
    %c0_38 = arith.constant 0 : index
    %173 = vector.load %arg4[%c1, %c0_37, %c0_38] : memref<3x32x128xf32, #tpu.memory_space<vmem>>, vector<1x32x128xf32>
    %174 = vector.shape_cast %173 : vector<1x32x128xf32> to vector<32x128xf32>
    %c1_39 = arith.constant 1 : index
    %c0_40 = arith.constant 0 : index
    %c0_41 = arith.constant 0 : index
    %175 = vector.load %arg5[%c1_39, %c0_40, %c0_41] : memref<3x1x128xf32, #tpu.memory_space<vmem>>, vector<1x1x128xf32>
    %176 = vector.shape_cast %175 : vector<1x1x128xf32> to vector<1x128xf32>
    %177 = vector.shape_cast %176 : vector<1x128xf32> to vector<1x128xf32>
    %178 = vector.broadcast %177 : vector<1x128xf32> to vector<8x128xf32>
    %cst_42 = arith.constant 0.000000e+00 : f32
    %179 = vector.broadcast %cst_42 : f32 to vector<8x32xf32>
    %cst_43 = arith.constant 0.000000e+00 : f32
    %180 = vector.broadcast %cst_43 : f32 to vector<8x32xf32>
    %181 = vector.extract_strided_slice %172 {offsets = [0, 0], sizes = [8, 128], strides = [1, 1]} : vector<64x128xf32> to vector<8x128xf32>
    %cst_44 = arith.constant dense<0.000000e+00> : vector<8x128xf32>
    %182 = tpu.matmul %179, %174, %cst_44 {dimension_numbers = #tpu.dot_dimension_numbers<[1], [0], [0], [1], [0, 0, 1, 1], [], []>} : vector<8x32xf32>, vector<32x128xf32>, vector<8x128xf32> -> vector<8x128xf32>
    %183 = arith.addf %181, %182 : vector<8x128xf32>
    %184 = arith.addf %183, %178 : vector<8x128xf32>
    %185 = arith.negf %184 : vector<8x128xf32>
    %186 = math.exp %185 : vector<8x128xf32>
    %cst_45 = arith.constant 1.000000e+00 : f32
    %187 = vector.broadcast %cst_45 : f32 to vector<8x128xf32>
    %188 = arith.addf %187, %186 : vector<8x128xf32>
    %189 = arith.divf %187, %188 : vector<8x128xf32>
    %190 = math.tanh %184 : vector<8x128xf32>
    %191 = vector.extract_strided_slice %189 {offsets = [0, 0], sizes = [8, 32], strides = [1, 1]} : vector<8x128xf32> to vector<8x32xf32>
    %192 = vector.extract_strided_slice %189 {offsets = [0, 32], sizes = [8, 32], strides = [1, 1]} : vector<8x128xf32> to vector<8x32xf32>
    %193 = vector.extract_strided_slice %190 {offsets = [0, 64], sizes = [8, 32], strides = [1, 1]} : vector<8x128xf32> to vector<8x32xf32>
    %194 = vector.extract_strided_slice %189 {offsets = [0, 96], sizes = [8, 32], strides = [1, 1]} : vector<8x128xf32> to vector<8x32xf32>
    %195 = arith.mulf %192, %180 : vector<8x32xf32>
    %196 = arith.mulf %191, %193 : vector<8x32xf32>
    %197 = arith.addf %195, %196 : vector<8x32xf32>
    %198 = math.tanh %197 : vector<8x32xf32>
    %199 = arith.mulf %194, %198 : vector<8x32xf32>
    %200 = vector.extract_strided_slice %172 {offsets = [8, 0], sizes = [8, 128], strides = [1, 1]} : vector<64x128xf32> to vector<8x128xf32>
    %cst_46 = arith.constant dense<0.000000e+00> : vector<8x128xf32>
    %201 = tpu.matmul %199, %174, %cst_46 {dimension_numbers = #tpu.dot_dimension_numbers<[1], [0], [0], [1], [0, 0, 1, 1], [], []>} : vector<8x32xf32>, vector<32x128xf32>, vector<8x128xf32> -> vector<8x128xf32>
    %202 = arith.addf %200, %201 : vector<8x128xf32>
    %203 = arith.addf %202, %178 : vector<8x128xf32>
    %204 = arith.negf %203 : vector<8x128xf32>
    %205 = math.exp %204 : vector<8x128xf32>
    %cst_47 = arith.constant 1.000000e+00 : f32
    %206 = vector.broadcast %cst_47 : f32 to vector<8x128xf32>
    %207 = arith.addf %206, %205 : vector<8x128xf32>
    %208 = arith.divf %206, %207 : vector<8x128xf32>
    %209 = math.tanh %203 : vector<8x128xf32>
    %210 = vector.extract_strided_slice %208 {offsets = [0, 0], sizes = [8, 32], strides = [1, 1]} : vector<8x128xf32> to vector<8x32xf32>
    %211 = vector.extract_strided_slice %208 {offsets = [0, 32], sizes = [8, 32], strides = [1, 1]} : vector<8x128xf32> to vector<8x32xf32>
    %212 = vector.extract_strided_slice %209 {offsets = [0, 64], sizes = [8, 32], strides = [1, 1]} : vector<8x128xf32> to vector<8x32xf32>
    %213 = vector.extract_strided_slice %208 {offsets = [0, 96], sizes = [8, 32], strides = [1, 1]} : vector<8x128xf32> to vector<8x32xf32>
    %214 = arith.mulf %211, %197 : vector<8x32xf32>
    %215 = arith.mulf %210, %212 : vector<8x32xf32>
    %216 = arith.addf %214, %215 : vector<8x32xf32>
    %217 = math.tanh %216 : vector<8x32xf32>
    %218 = arith.mulf %213, %217 : vector<8x32xf32>
    %219 = vector.extract_strided_slice %172 {offsets = [16, 0], sizes = [8, 128], strides = [1, 1]} : vector<64x128xf32> to vector<8x128xf32>
    %cst_48 = arith.constant dense<0.000000e+00> : vector<8x128xf32>
    %220 = tpu.matmul %218, %174, %cst_48 {dimension_numbers = #tpu.dot_dimension_numbers<[1], [0], [0], [1], [0, 0, 1, 1], [], []>} : vector<8x32xf32>, vector<32x128xf32>, vector<8x128xf32> -> vector<8x128xf32>
    %221 = arith.addf %219, %220 : vector<8x128xf32>
    %222 = arith.addf %221, %178 : vector<8x128xf32>
    %223 = arith.negf %222 : vector<8x128xf32>
    %224 = math.exp %223 : vector<8x128xf32>
    %cst_49 = arith.constant 1.000000e+00 : f32
    %225 = vector.broadcast %cst_49 : f32 to vector<8x128xf32>
    %226 = arith.addf %225, %224 : vector<8x128xf32>
    %227 = arith.divf %225, %226 : vector<8x128xf32>
    %228 = math.tanh %222 : vector<8x128xf32>
    %229 = vector.extract_strided_slice %227 {offsets = [0, 0], sizes = [8, 32], strides = [1, 1]} : vector<8x128xf32> to vector<8x32xf32>
    %230 = vector.extract_strided_slice %227 {offsets = [0, 32], sizes = [8, 32], strides = [1, 1]} : vector<8x128xf32> to vector<8x32xf32>
    %231 = vector.extract_strided_slice %228 {offsets = [0, 64], sizes = [8, 32], strides = [1, 1]} : vector<8x128xf32> to vector<8x32xf32>
    %232 = vector.extract_strided_slice %227 {offsets = [0, 96], sizes = [8, 32], strides = [1, 1]} : vector<8x128xf32> to vector<8x32xf32>
    %233 = arith.mulf %230, %216 : vector<8x32xf32>
    %234 = arith.mulf %229, %231 : vector<8x32xf32>
    %235 = arith.addf %233, %234 : vector<8x32xf32>
    %236 = math.tanh %235 : vector<8x32xf32>
    %237 = arith.mulf %232, %236 : vector<8x32xf32>
    %238 = vector.extract_strided_slice %172 {offsets = [24, 0], sizes = [8, 128], strides = [1, 1]} : vector<64x128xf32> to vector<8x128xf32>
    %cst_50 = arith.constant dense<0.000000e+00> : vector<8x128xf32>
    %239 = tpu.matmul %237, %174, %cst_50 {dimension_numbers = #tpu.dot_dimension_numbers<[1], [0], [0], [1], [0, 0, 1, 1], [], []>} : vector<8x32xf32>, vector<32x128xf32>, vector<8x128xf32> -> vector<8x128xf32>
    %240 = arith.addf %238, %239 : vector<8x128xf32>
    %241 = arith.addf %240, %178 : vector<8x128xf32>
    %242 = arith.negf %241 : vector<8x128xf32>
    %243 = math.exp %242 : vector<8x128xf32>
    %cst_51 = arith.constant 1.000000e+00 : f32
    %244 = vector.broadcast %cst_51 : f32 to vector<8x128xf32>
    %245 = arith.addf %244, %243 : vector<8x128xf32>
    %246 = arith.divf %244, %245 : vector<8x128xf32>
    %247 = math.tanh %241 : vector<8x128xf32>
    %248 = vector.extract_strided_slice %246 {offsets = [0, 0], sizes = [8, 32], strides = [1, 1]} : vector<8x128xf32> to vector<8x32xf32>
    %249 = vector.extract_strided_slice %246 {offsets = [0, 32], sizes = [8, 32], strides = [1, 1]} : vector<8x128xf32> to vector<8x32xf32>
    %250 = vector.extract_strided_slice %247 {offsets = [0, 64], sizes = [8, 32], strides = [1, 1]} : vector<8x128xf32> to vector<8x32xf32>
    %251 = vector.extract_strided_slice %246 {offsets = [0, 96], sizes = [8, 32], strides = [1, 1]} : vector<8x128xf32> to vector<8x32xf32>
    %252 = arith.mulf %249, %235 : vector<8x32xf32>
    %253 = arith.mulf %248, %250 : vector<8x32xf32>
    %254 = arith.addf %252, %253 : vector<8x32xf32>
    %255 = math.tanh %254 : vector<8x32xf32>
    %256 = arith.mulf %251, %255 : vector<8x32xf32>
    %257 = vector.extract_strided_slice %172 {offsets = [32, 0], sizes = [8, 128], strides = [1, 1]} : vector<64x128xf32> to vector<8x128xf32>
    %cst_52 = arith.constant dense<0.000000e+00> : vector<8x128xf32>
    %258 = tpu.matmul %256, %174, %cst_52 {dimension_numbers = #tpu.dot_dimension_numbers<[1], [0], [0], [1], [0, 0, 1, 1], [], []>} : vector<8x32xf32>, vector<32x128xf32>, vector<8x128xf32> -> vector<8x128xf32>
    %259 = arith.addf %257, %258 : vector<8x128xf32>
    %260 = arith.addf %259, %178 : vector<8x128xf32>
    %261 = arith.negf %260 : vector<8x128xf32>
    %262 = math.exp %261 : vector<8x128xf32>
    %cst_53 = arith.constant 1.000000e+00 : f32
    %263 = vector.broadcast %cst_53 : f32 to vector<8x128xf32>
    %264 = arith.addf %263, %262 : vector<8x128xf32>
    %265 = arith.divf %263, %264 : vector<8x128xf32>
    %266 = math.tanh %260 : vector<8x128xf32>
    %267 = vector.extract_strided_slice %265 {offsets = [0, 0], sizes = [8, 32], strides = [1, 1]} : vector<8x128xf32> to vector<8x32xf32>
    %268 = vector.extract_strided_slice %265 {offsets = [0, 32], sizes = [8, 32], strides = [1, 1]} : vector<8x128xf32> to vector<8x32xf32>
    %269 = vector.extract_strided_slice %266 {offsets = [0, 64], sizes = [8, 32], strides = [1, 1]} : vector<8x128xf32> to vector<8x32xf32>
    %270 = vector.extract_strided_slice %265 {offsets = [0, 96], sizes = [8, 32], strides = [1, 1]} : vector<8x128xf32> to vector<8x32xf32>
    %271 = arith.mulf %268, %254 : vector<8x32xf32>
    %272 = arith.mulf %267, %269 : vector<8x32xf32>
    %273 = arith.addf %271, %272 : vector<8x32xf32>
    %274 = math.tanh %273 : vector<8x32xf32>
    %275 = arith.mulf %270, %274 : vector<8x32xf32>
    %276 = vector.extract_strided_slice %172 {offsets = [40, 0], sizes = [8, 128], strides = [1, 1]} : vector<64x128xf32> to vector<8x128xf32>
    %cst_54 = arith.constant dense<0.000000e+00> : vector<8x128xf32>
    %277 = tpu.matmul %275, %174, %cst_54 {dimension_numbers = #tpu.dot_dimension_numbers<[1], [0], [0], [1], [0, 0, 1, 1], [], []>} : vector<8x32xf32>, vector<32x128xf32>, vector<8x128xf32> -> vector<8x128xf32>
    %278 = arith.addf %276, %277 : vector<8x128xf32>
    %279 = arith.addf %278, %178 : vector<8x128xf32>
    %280 = arith.negf %279 : vector<8x128xf32>
    %281 = math.exp %280 : vector<8x128xf32>
    %cst_55 = arith.constant 1.000000e+00 : f32
    %282 = vector.broadcast %cst_55 : f32 to vector<8x128xf32>
    %283 = arith.addf %282, %281 : vector<8x128xf32>
    %284 = arith.divf %282, %283 : vector<8x128xf32>
    %285 = math.tanh %279 : vector<8x128xf32>
    %286 = vector.extract_strided_slice %284 {offsets = [0, 0], sizes = [8, 32], strides = [1, 1]} : vector<8x128xf32> to vector<8x32xf32>
    %287 = vector.extract_strided_slice %284 {offsets = [0, 32], sizes = [8, 32], strides = [1, 1]} : vector<8x128xf32> to vector<8x32xf32>
    %288 = vector.extract_strided_slice %285 {offsets = [0, 64], sizes = [8, 32], strides = [1, 1]} : vector<8x128xf32> to vector<8x32xf32>
    %289 = vector.extract_strided_slice %284 {offsets = [0, 96], sizes = [8, 32], strides = [1, 1]} : vector<8x128xf32> to vector<8x32xf32>
    %290 = arith.mulf %287, %273 : vector<8x32xf32>
    %291 = arith.mulf %286, %288 : vector<8x32xf32>
    %292 = arith.addf %290, %291 : vector<8x32xf32>
    %293 = math.tanh %292 : vector<8x32xf32>
    %294 = arith.mulf %289, %293 : vector<8x32xf32>
    %295 = vector.extract_strided_slice %172 {offsets = [48, 0], sizes = [8, 128], strides = [1, 1]} : vector<64x128xf32> to vector<8x128xf32>
    %cst_56 = arith.constant dense<0.000000e+00> : vector<8x128xf32>
    %296 = tpu.matmul %294, %174, %cst_56 {dimension_numbers = #tpu.dot_dimension_numbers<[1], [0], [0], [1], [0, 0, 1, 1], [], []>} : vector<8x32xf32>, vector<32x128xf32>, vector<8x128xf32> -> vector<8x128xf32>
    %297 = arith.addf %295, %296 : vector<8x128xf32>
    %298 = arith.addf %297, %178 : vector<8x128xf32>
    %299 = arith.negf %298 : vector<8x128xf32>
    %300 = math.exp %299 : vector<8x128xf32>
    %cst_57 = arith.constant 1.000000e+00 : f32
    %301 = vector.broadcast %cst_57 : f32 to vector<8x128xf32>
    %302 = arith.addf %301, %300 : vector<8x128xf32>
    %303 = arith.divf %301, %302 : vector<8x128xf32>
    %304 = math.tanh %298 : vector<8x128xf32>
    %305 = vector.extract_strided_slice %303 {offsets = [0, 0], sizes = [8, 32], strides = [1, 1]} : vector<8x128xf32> to vector<8x32xf32>
    %306 = vector.extract_strided_slice %303 {offsets = [0, 32], sizes = [8, 32], strides = [1, 1]} : vector<8x128xf32> to vector<8x32xf32>
    %307 = vector.extract_strided_slice %304 {offsets = [0, 64], sizes = [8, 32], strides = [1, 1]} : vector<8x128xf32> to vector<8x32xf32>
    %308 = vector.extract_strided_slice %303 {offsets = [0, 96], sizes = [8, 32], strides = [1, 1]} : vector<8x128xf32> to vector<8x32xf32>
    %309 = arith.mulf %306, %292 : vector<8x32xf32>
    %310 = arith.mulf %305, %307 : vector<8x32xf32>
    %311 = arith.addf %309, %310 : vector<8x32xf32>
    %312 = math.tanh %311 : vector<8x32xf32>
    %313 = arith.mulf %308, %312 : vector<8x32xf32>
    %314 = vector.extract_strided_slice %172 {offsets = [56, 0], sizes = [8, 128], strides = [1, 1]} : vector<64x128xf32> to vector<8x128xf32>
    %cst_58 = arith.constant dense<0.000000e+00> : vector<8x128xf32>
    %315 = tpu.matmul %313, %174, %cst_58 {dimension_numbers = #tpu.dot_dimension_numbers<[1], [0], [0], [1], [0, 0, 1, 1], [], []>} : vector<8x32xf32>, vector<32x128xf32>, vector<8x128xf32> -> vector<8x128xf32>
    %316 = arith.addf %314, %315 : vector<8x128xf32>
    %317 = arith.addf %316, %178 : vector<8x128xf32>
    %318 = arith.negf %317 : vector<8x128xf32>
    %319 = math.exp %318 : vector<8x128xf32>
    %cst_59 = arith.constant 1.000000e+00 : f32
    %320 = vector.broadcast %cst_59 : f32 to vector<8x128xf32>
    %321 = arith.addf %320, %319 : vector<8x128xf32>
    %322 = arith.divf %320, %321 : vector<8x128xf32>
    %323 = math.tanh %317 : vector<8x128xf32>
    %324 = vector.extract_strided_slice %322 {offsets = [0, 0], sizes = [8, 32], strides = [1, 1]} : vector<8x128xf32> to vector<8x32xf32>
    %325 = vector.extract_strided_slice %322 {offsets = [0, 32], sizes = [8, 32], strides = [1, 1]} : vector<8x128xf32> to vector<8x32xf32>
    %326 = vector.extract_strided_slice %323 {offsets = [0, 64], sizes = [8, 32], strides = [1, 1]} : vector<8x128xf32> to vector<8x32xf32>
    %327 = vector.extract_strided_slice %322 {offsets = [0, 96], sizes = [8, 32], strides = [1, 1]} : vector<8x128xf32> to vector<8x32xf32>
    %328 = arith.mulf %325, %311 : vector<8x32xf32>
    %329 = arith.mulf %324, %326 : vector<8x32xf32>
    %330 = arith.addf %328, %329 : vector<8x32xf32>
    %331 = math.tanh %330 : vector<8x32xf32>
    %332 = arith.mulf %327, %331 : vector<8x32xf32>
    %c1_60 = arith.constant 1 : index
    %c0_61 = arith.constant 0 : index
    %c0_62 = arith.constant 0 : index
    %333 = vector.load %arg9[%c1_60, %c0_61, %c0_62] : memref<3x8x32xf32, #tpu.memory_space<vmem>>, vector<1x8x32xf32>
    %334 = vector.shape_cast %333 : vector<1x8x32xf32> to vector<8x32xf32>
    %335 = vector.shape_cast %332 : vector<8x32xf32> to vector<1x8x32xf32>
    tpu.vector_store %arg9[%c1_60, %c0_61, %c0_62], %335 {strides = array<i32>} : memref<3x8x32xf32, #tpu.memory_space<vmem>>, vector<1x8x32xf32>,
    %c1_63 = arith.constant 1 : index
    %c0_64 = arith.constant 0 : index
    %c0_65 = arith.constant 0 : index
    %336 = vector.load %arg10[%c1_63, %c0_64, %c0_65] : memref<3x8x32xf32, #tpu.memory_space<vmem>>, vector<1x8x32xf32>
    %337 = vector.shape_cast %336 : vector<1x8x32xf32> to vector<8x32xf32>
    %338 = vector.shape_cast %330 : vector<8x32xf32> to vector<1x8x32xf32>
    tpu.vector_store %arg10[%c1_63, %c0_64, %c0_65], %338 {strides = array<i32>} : memref<3x8x32xf32, #tpu.memory_space<vmem>>, vector<1x8x32xf32>,
    %339 = tpu.concatenate %199, %218, %237, %256, %275, %294, %313, %332 in 0 : vector<8x32xf32>, vector<8x32xf32>, vector<8x32xf32>, vector<8x32xf32>, vector<8x32xf32>, vector<8x32xf32>, vector<8x32xf32>, vector<8x32xf32> -> vector<64x32xf32>
    %c1_66 = arith.constant 1 : index
    %c0_67 = arith.constant 0 : index
    %c0_68 = arith.constant 0 : index
    %340 = vector.load %arg3[%c1_66, %c0_67, %c0_68] : memref<2x32x128xf32, #tpu.memory_space<vmem>>, vector<1x32x128xf32>
    %341 = vector.shape_cast %340 : vector<1x32x128xf32> to vector<32x128xf32>
    %cst_69 = arith.constant dense<0.000000e+00> : vector<64x128xf32>
    %342 = tpu.matmul %339, %341, %cst_69 {dimension_numbers = #tpu.dot_dimension_numbers<[1], [0], [0], [1], [0, 0, 1, 1], [], []>} : vector<64x32xf32>, vector<32x128xf32>, vector<64x128xf32> -> vector<64x128xf32>
    %c2 = arith.constant 2 : index
    %c0_70 = arith.constant 0 : index
    %c0_71 = arith.constant 0 : index
    %343 = vector.load %arg4[%c2, %c0_70, %c0_71] : memref<3x32x128xf32, #tpu.memory_space<vmem>>, vector<1x32x128xf32>
    %344 = vector.shape_cast %343 : vector<1x32x128xf32> to vector<32x128xf32>
    %c2_72 = arith.constant 2 : index
    %c0_73 = arith.constant 0 : index
    %c0_74 = arith.constant 0 : index
    %345 = vector.load %arg5[%c2_72, %c0_73, %c0_74] : memref<3x1x128xf32, #tpu.memory_space<vmem>>, vector<1x1x128xf32>
    %346 = vector.shape_cast %345 : vector<1x1x128xf32> to vector<1x128xf32>
    %347 = vector.shape_cast %346 : vector<1x128xf32> to vector<1x128xf32>
    %348 = vector.broadcast %347 : vector<1x128xf32> to vector<8x128xf32>
    %cst_75 = arith.constant 0.000000e+00 : f32
    %349 = vector.broadcast %cst_75 : f32 to vector<8x32xf32>
    %cst_76 = arith.constant 0.000000e+00 : f32
    %350 = vector.broadcast %cst_76 : f32 to vector<8x32xf32>
    %351 = vector.extract_strided_slice %342 {offsets = [0, 0], sizes = [8, 128], strides = [1, 1]} : vector<64x128xf32> to vector<8x128xf32>
    %cst_77 = arith.constant dense<0.000000e+00> : vector<8x128xf32>
    %352 = tpu.matmul %349, %344, %cst_77 {dimension_numbers = #tpu.dot_dimension_numbers<[1], [0], [0], [1], [0, 0, 1, 1], [], []>} : vector<8x32xf32>, vector<32x128xf32>, vector<8x128xf32> -> vector<8x128xf32>
    %353 = arith.addf %351, %352 : vector<8x128xf32>
    %354 = arith.addf %353, %348 : vector<8x128xf32>
    %355 = arith.negf %354 : vector<8x128xf32>
    %356 = math.exp %355 : vector<8x128xf32>
    %cst_78 = arith.constant 1.000000e+00 : f32
    %357 = vector.broadcast %cst_78 : f32 to vector<8x128xf32>
    %358 = arith.addf %357, %356 : vector<8x128xf32>
    %359 = arith.divf %357, %358 : vector<8x128xf32>
    %360 = math.tanh %354 : vector<8x128xf32>
    %361 = vector.extract_strided_slice %359 {offsets = [0, 0], sizes = [8, 32], strides = [1, 1]} : vector<8x128xf32> to vector<8x32xf32>
    %362 = vector.extract_strided_slice %359 {offsets = [0, 32], sizes = [8, 32], strides = [1, 1]} : vector<8x128xf32> to vector<8x32xf32>
    %363 = vector.extract_strided_slice %360 {offsets = [0, 64], sizes = [8, 32], strides = [1, 1]} : vector<8x128xf32> to vector<8x32xf32>
    %364 = vector.extract_strided_slice %359 {offsets = [0, 96], sizes = [8, 32], strides = [1, 1]} : vector<8x128xf32> to vector<8x32xf32>
    %365 = arith.mulf %362, %350 : vector<8x32xf32>
    %366 = arith.mulf %361, %363 : vector<8x32xf32>
    %367 = arith.addf %365, %366 : vector<8x32xf32>
    %368 = math.tanh %367 : vector<8x32xf32>
    %369 = arith.mulf %364, %368 : vector<8x32xf32>
    %370 = vector.extract_strided_slice %342 {offsets = [8, 0], sizes = [8, 128], strides = [1, 1]} : vector<64x128xf32> to vector<8x128xf32>
    %cst_79 = arith.constant dense<0.000000e+00> : vector<8x128xf32>
    %371 = tpu.matmul %369, %344, %cst_79 {dimension_numbers = #tpu.dot_dimension_numbers<[1], [0], [0], [1], [0, 0, 1, 1], [], []>} : vector<8x32xf32>, vector<32x128xf32>, vector<8x128xf32> -> vector<8x128xf32>
    %372 = arith.addf %370, %371 : vector<8x128xf32>
    %373 = arith.addf %372, %348 : vector<8x128xf32>
    %374 = arith.negf %373 : vector<8x128xf32>
    %375 = math.exp %374 : vector<8x128xf32>
    %cst_80 = arith.constant 1.000000e+00 : f32
    %376 = vector.broadcast %cst_80 : f32 to vector<8x128xf32>
    %377 = arith.addf %376, %375 : vector<8x128xf32>
    %378 = arith.divf %376, %377 : vector<8x128xf32>
    %379 = math.tanh %373 : vector<8x128xf32>
    %380 = vector.extract_strided_slice %378 {offsets = [0, 0], sizes = [8, 32], strides = [1, 1]} : vector<8x128xf32> to vector<8x32xf32>
    %381 = vector.extract_strided_slice %378 {offsets = [0, 32], sizes = [8, 32], strides = [1, 1]} : vector<8x128xf32> to vector<8x32xf32>
    %382 = vector.extract_strided_slice %379 {offsets = [0, 64], sizes = [8, 32], strides = [1, 1]} : vector<8x128xf32> to vector<8x32xf32>
    %383 = vector.extract_strided_slice %378 {offsets = [0, 96], sizes = [8, 32], strides = [1, 1]} : vector<8x128xf32> to vector<8x32xf32>
    %384 = arith.mulf %381, %367 : vector<8x32xf32>
    %385 = arith.mulf %380, %382 : vector<8x32xf32>
    %386 = arith.addf %384, %385 : vector<8x32xf32>
    %387 = math.tanh %386 : vector<8x32xf32>
    %388 = arith.mulf %383, %387 : vector<8x32xf32>
    %389 = vector.extract_strided_slice %342 {offsets = [16, 0], sizes = [8, 128], strides = [1, 1]} : vector<64x128xf32> to vector<8x128xf32>
    %cst_81 = arith.constant dense<0.000000e+00> : vector<8x128xf32>
    %390 = tpu.matmul %388, %344, %cst_81 {dimension_numbers = #tpu.dot_dimension_numbers<[1], [0], [0], [1], [0, 0, 1, 1], [], []>} : vector<8x32xf32>, vector<32x128xf32>, vector<8x128xf32> -> vector<8x128xf32>
    %391 = arith.addf %389, %390 : vector<8x128xf32>
    %392 = arith.addf %391, %348 : vector<8x128xf32>
    %393 = arith.negf %392 : vector<8x128xf32>
    %394 = math.exp %393 : vector<8x128xf32>
    %cst_82 = arith.constant 1.000000e+00 : f32
    %395 = vector.broadcast %cst_82 : f32 to vector<8x128xf32>
    %396 = arith.addf %395, %394 : vector<8x128xf32>
    %397 = arith.divf %395, %396 : vector<8x128xf32>
    %398 = math.tanh %392 : vector<8x128xf32>
    %399 = vector.extract_strided_slice %397 {offsets = [0, 0], sizes = [8, 32], strides = [1, 1]} : vector<8x128xf32> to vector<8x32xf32>
    %400 = vector.extract_strided_slice %397 {offsets = [0, 32], sizes = [8, 32], strides = [1, 1]} : vector<8x128xf32> to vector<8x32xf32>
    %401 = vector.extract_strided_slice %398 {offsets = [0, 64], sizes = [8, 32], strides = [1, 1]} : vector<8x128xf32> to vector<8x32xf32>
    %402 = vector.extract_strided_slice %397 {offsets = [0, 96], sizes = [8, 32], strides = [1, 1]} : vector<8x128xf32> to vector<8x32xf32>
    %403 = arith.mulf %400, %386 : vector<8x32xf32>
    %404 = arith.mulf %399, %401 : vector<8x32xf32>
    %405 = arith.addf %403, %404 : vector<8x32xf32>
    %406 = math.tanh %405 : vector<8x32xf32>
    %407 = arith.mulf %402, %406 : vector<8x32xf32>
    %408 = vector.extract_strided_slice %342 {offsets = [24, 0], sizes = [8, 128], strides = [1, 1]} : vector<64x128xf32> to vector<8x128xf32>
    %cst_83 = arith.constant dense<0.000000e+00> : vector<8x128xf32>
    %409 = tpu.matmul %407, %344, %cst_83 {dimension_numbers = #tpu.dot_dimension_numbers<[1], [0], [0], [1], [0, 0, 1, 1], [], []>} : vector<8x32xf32>, vector<32x128xf32>, vector<8x128xf32> -> vector<8x128xf32>
    %410 = arith.addf %408, %409 : vector<8x128xf32>
    %411 = arith.addf %410, %348 : vector<8x128xf32>
    %412 = arith.negf %411 : vector<8x128xf32>
    %413 = math.exp %412 : vector<8x128xf32>
    %cst_84 = arith.constant 1.000000e+00 : f32
    %414 = vector.broadcast %cst_84 : f32 to vector<8x128xf32>
    %415 = arith.addf %414, %413 : vector<8x128xf32>
    %416 = arith.divf %414, %415 : vector<8x128xf32>
    %417 = math.tanh %411 : vector<8x128xf32>
    %418 = vector.extract_strided_slice %416 {offsets = [0, 0], sizes = [8, 32], strides = [1, 1]} : vector<8x128xf32> to vector<8x32xf32>
    %419 = vector.extract_strided_slice %416 {offsets = [0, 32], sizes = [8, 32], strides = [1, 1]} : vector<8x128xf32> to vector<8x32xf32>
    %420 = vector.extract_strided_slice %417 {offsets = [0, 64], sizes = [8, 32], strides = [1, 1]} : vector<8x128xf32> to vector<8x32xf32>
    %421 = vector.extract_strided_slice %416 {offsets = [0, 96], sizes = [8, 32], strides = [1, 1]} : vector<8x128xf32> to vector<8x32xf32>
    %422 = arith.mulf %419, %405 : vector<8x32xf32>
    %423 = arith.mulf %418, %420 : vector<8x32xf32>
    %424 = arith.addf %422, %423 : vector<8x32xf32>
    %425 = math.tanh %424 : vector<8x32xf32>
    %426 = arith.mulf %421, %425 : vector<8x32xf32>
    %427 = vector.extract_strided_slice %342 {offsets = [32, 0], sizes = [8, 128], strides = [1, 1]} : vector<64x128xf32> to vector<8x128xf32>
    %cst_85 = arith.constant dense<0.000000e+00> : vector<8x128xf32>
    %428 = tpu.matmul %426, %344, %cst_85 {dimension_numbers = #tpu.dot_dimension_numbers<[1], [0], [0], [1], [0, 0, 1, 1], [], []>} : vector<8x32xf32>, vector<32x128xf32>, vector<8x128xf32> -> vector<8x128xf32>
    %429 = arith.addf %427, %428 : vector<8x128xf32>
    %430 = arith.addf %429, %348 : vector<8x128xf32>
    %431 = arith.negf %430 : vector<8x128xf32>
    %432 = math.exp %431 : vector<8x128xf32>
    %cst_86 = arith.constant 1.000000e+00 : f32
    %433 = vector.broadcast %cst_86 : f32 to vector<8x128xf32>
    %434 = arith.addf %433, %432 : vector<8x128xf32>
    %435 = arith.divf %433, %434 : vector<8x128xf32>
    %436 = math.tanh %430 : vector<8x128xf32>
    %437 = vector.extract_strided_slice %435 {offsets = [0, 0], sizes = [8, 32], strides = [1, 1]} : vector<8x128xf32> to vector<8x32xf32>
    %438 = vector.extract_strided_slice %435 {offsets = [0, 32], sizes = [8, 32], strides = [1, 1]} : vector<8x128xf32> to vector<8x32xf32>
    %439 = vector.extract_strided_slice %436 {offsets = [0, 64], sizes = [8, 32], strides = [1, 1]} : vector<8x128xf32> to vector<8x32xf32>
    %440 = vector.extract_strided_slice %435 {offsets = [0, 96], sizes = [8, 32], strides = [1, 1]} : vector<8x128xf32> to vector<8x32xf32>
    %441 = arith.mulf %438, %424 : vector<8x32xf32>
    %442 = arith.mulf %437, %439 : vector<8x32xf32>
    %443 = arith.addf %441, %442 : vector<8x32xf32>
    %444 = math.tanh %443 : vector<8x32xf32>
    %445 = arith.mulf %440, %444 : vector<8x32xf32>
    %446 = vector.extract_strided_slice %342 {offsets = [40, 0], sizes = [8, 128], strides = [1, 1]} : vector<64x128xf32> to vector<8x128xf32>
    %cst_87 = arith.constant dense<0.000000e+00> : vector<8x128xf32>
    %447 = tpu.matmul %445, %344, %cst_87 {dimension_numbers = #tpu.dot_dimension_numbers<[1], [0], [0], [1], [0, 0, 1, 1], [], []>} : vector<8x32xf32>, vector<32x128xf32>, vector<8x128xf32> -> vector<8x128xf32>
    %448 = arith.addf %446, %447 : vector<8x128xf32>
    %449 = arith.addf %448, %348 : vector<8x128xf32>
    %450 = arith.negf %449 : vector<8x128xf32>
    %451 = math.exp %450 : vector<8x128xf32>
    %cst_88 = arith.constant 1.000000e+00 : f32
    %452 = vector.broadcast %cst_88 : f32 to vector<8x128xf32>
    %453 = arith.addf %452, %451 : vector<8x128xf32>
    %454 = arith.divf %452, %453 : vector<8x128xf32>
    %455 = math.tanh %449 : vector<8x128xf32>
    %456 = vector.extract_strided_slice %454 {offsets = [0, 0], sizes = [8, 32], strides = [1, 1]} : vector<8x128xf32> to vector<8x32xf32>
    %457 = vector.extract_strided_slice %454 {offsets = [0, 32], sizes = [8, 32], strides = [1, 1]} : vector<8x128xf32> to vector<8x32xf32>
    %458 = vector.extract_strided_slice %455 {offsets = [0, 64], sizes = [8, 32], strides = [1, 1]} : vector<8x128xf32> to vector<8x32xf32>
    %459 = vector.extract_strided_slice %454 {offsets = [0, 96], sizes = [8, 32], strides = [1, 1]} : vector<8x128xf32> to vector<8x32xf32>
    %460 = arith.mulf %457, %443 : vector<8x32xf32>
    %461 = arith.mulf %456, %458 : vector<8x32xf32>
    %462 = arith.addf %460, %461 : vector<8x32xf32>
    %463 = math.tanh %462 : vector<8x32xf32>
    %464 = arith.mulf %459, %463 : vector<8x32xf32>
    %465 = vector.extract_strided_slice %342 {offsets = [48, 0], sizes = [8, 128], strides = [1, 1]} : vector<64x128xf32> to vector<8x128xf32>
    %cst_89 = arith.constant dense<0.000000e+00> : vector<8x128xf32>
    %466 = tpu.matmul %464, %344, %cst_89 {dimension_numbers = #tpu.dot_dimension_numbers<[1], [0], [0], [1], [0, 0, 1, 1], [], []>} : vector<8x32xf32>, vector<32x128xf32>, vector<8x128xf32> -> vector<8x128xf32>
    %467 = arith.addf %465, %466 : vector<8x128xf32>
    %468 = arith.addf %467, %348 : vector<8x128xf32>
    %469 = arith.negf %468 : vector<8x128xf32>
    %470 = math.exp %469 : vector<8x128xf32>
    %cst_90 = arith.constant 1.000000e+00 : f32
    %471 = vector.broadcast %cst_90 : f32 to vector<8x128xf32>
    %472 = arith.addf %471, %470 : vector<8x128xf32>
    %473 = arith.divf %471, %472 : vector<8x128xf32>
    %474 = math.tanh %468 : vector<8x128xf32>
    %475 = vector.extract_strided_slice %473 {offsets = [0, 0], sizes = [8, 32], strides = [1, 1]} : vector<8x128xf32> to vector<8x32xf32>
    %476 = vector.extract_strided_slice %473 {offsets = [0, 32], sizes = [8, 32], strides = [1, 1]} : vector<8x128xf32> to vector<8x32xf32>
    %477 = vector.extract_strided_slice %474 {offsets = [0, 64], sizes = [8, 32], strides = [1, 1]} : vector<8x128xf32> to vector<8x32xf32>
    %478 = vector.extract_strided_slice %473 {offsets = [0, 96], sizes = [8, 32], strides = [1, 1]} : vector<8x128xf32> to vector<8x32xf32>
    %479 = arith.mulf %476, %462 : vector<8x32xf32>
    %480 = arith.mulf %475, %477 : vector<8x32xf32>
    %481 = arith.addf %479, %480 : vector<8x32xf32>
    %482 = math.tanh %481 : vector<8x32xf32>
    %483 = arith.mulf %478, %482 : vector<8x32xf32>
    %484 = vector.extract_strided_slice %342 {offsets = [56, 0], sizes = [8, 128], strides = [1, 1]} : vector<64x128xf32> to vector<8x128xf32>
    %cst_91 = arith.constant dense<0.000000e+00> : vector<8x128xf32>
    %485 = tpu.matmul %483, %344, %cst_91 {dimension_numbers = #tpu.dot_dimension_numbers<[1], [0], [0], [1], [0, 0, 1, 1], [], []>} : vector<8x32xf32>, vector<32x128xf32>, vector<8x128xf32> -> vector<8x128xf32>
    %486 = arith.addf %484, %485 : vector<8x128xf32>
    %487 = arith.addf %486, %348 : vector<8x128xf32>
    %488 = arith.negf %487 : vector<8x128xf32>
    %489 = math.exp %488 : vector<8x128xf32>
    %cst_92 = arith.constant 1.000000e+00 : f32
    %490 = vector.broadcast %cst_92 : f32 to vector<8x128xf32>
    %491 = arith.addf %490, %489 : vector<8x128xf32>
    %492 = arith.divf %490, %491 : vector<8x128xf32>
    %493 = math.tanh %487 : vector<8x128xf32>
    %494 = vector.extract_strided_slice %492 {offsets = [0, 0], sizes = [8, 32], strides = [1, 1]} : vector<8x128xf32> to vector<8x32xf32>
    %495 = vector.extract_strided_slice %492 {offsets = [0, 32], sizes = [8, 32], strides = [1, 1]} : vector<8x128xf32> to vector<8x32xf32>
    %496 = vector.extract_strided_slice %493 {offsets = [0, 64], sizes = [8, 32], strides = [1, 1]} : vector<8x128xf32> to vector<8x32xf32>
    %497 = vector.extract_strided_slice %492 {offsets = [0, 96], sizes = [8, 32], strides = [1, 1]} : vector<8x128xf32> to vector<8x32xf32>
    %498 = arith.mulf %495, %481 : vector<8x32xf32>
    %499 = arith.mulf %494, %496 : vector<8x32xf32>
    %500 = arith.addf %498, %499 : vector<8x32xf32>
    %501 = math.tanh %500 : vector<8x32xf32>
    %502 = arith.mulf %497, %501 : vector<8x32xf32>
    %c2_93 = arith.constant 2 : index
    %c0_94 = arith.constant 0 : index
    %c0_95 = arith.constant 0 : index
    %503 = vector.load %arg9[%c2_93, %c0_94, %c0_95] : memref<3x8x32xf32, #tpu.memory_space<vmem>>, vector<1x8x32xf32>
    %504 = vector.shape_cast %503 : vector<1x8x32xf32> to vector<8x32xf32>
    %505 = vector.shape_cast %502 : vector<8x32xf32> to vector<1x8x32xf32>
    tpu.vector_store %arg9[%c2_93, %c0_94, %c0_95], %505 {strides = array<i32>} : memref<3x8x32xf32, #tpu.memory_space<vmem>>, vector<1x8x32xf32>,
    %c2_96 = arith.constant 2 : index
    %c0_97 = arith.constant 0 : index
    %c0_98 = arith.constant 0 : index
    %506 = vector.load %arg10[%c2_96, %c0_97, %c0_98] : memref<3x8x32xf32, #tpu.memory_space<vmem>>, vector<1x8x32xf32>
    %507 = vector.shape_cast %506 : vector<1x8x32xf32> to vector<8x32xf32>
    %508 = vector.shape_cast %500 : vector<8x32xf32> to vector<1x8x32xf32>
    tpu.vector_store %arg10[%c2_96, %c0_97, %c0_98], %508 {strides = array<i32>} : memref<3x8x32xf32, #tpu.memory_space<vmem>>, vector<1x8x32xf32>,
    %509 = tpu.concatenate %369, %388, %407, %426, %445, %464, %483, %502 in 0 : vector<8x32xf32>, vector<8x32xf32>, vector<8x32xf32>, vector<8x32xf32>, vector<8x32xf32>, vector<8x32xf32>, vector<8x32xf32>, vector<8x32xf32> -> vector<64x32xf32>
    %c0_99 = arith.constant 0 : index
    %c0_100 = arith.constant 0 : index
    %510 = vector.load %arg6[%c0_99, %c0_100] : memref<32x128xf32, #tpu.memory_space<vmem>>, vector<32x128xf32>
    %cst_101 = arith.constant dense<0.000000e+00> : vector<64x128xf32>
    %511 = tpu.matmul %509, %510, %cst_101 {dimension_numbers = #tpu.dot_dimension_numbers<[1], [0], [0], [1], [0, 0, 1, 1], [], []>} : vector<64x32xf32>, vector<32x128xf32>, vector<64x128xf32> -> vector<64x128xf32>
    %c0_102 = arith.constant 0 : index
    %c0_103 = arith.constant 0 : index
    %512 = vector.load %arg7[%c0_102, %c0_103] : memref<1x128xf32, #tpu.memory_space<vmem>>, vector<1x128xf32>
    %513 = vector.broadcast %512 : vector<1x128xf32> to vector<64x128xf32>
    %514 = arith.addf %511, %513 : vector<64x128xf32>
    %c0_104 = arith.constant 0 : index
    %c0_105 = arith.constant 0 : index
    %515 = vector.load %arg8[%c0_104, %c0_105] : memref<64x128xf32, #tpu.memory_space<vmem>>, vector<64x128xf32>
    tpu.vector_store %arg8[%c0_104, %c0_105], %514 {strides = array<i32>} : memref<64x128xf32, #tpu.memory_space<vmem>>, vector<64x128xf32>,
    return
  }
  func.func @transform_0(%arg0: i32) -> (i32, i32) {
    %c0_i32 = arith.constant 0 : i32
    %c0_i32_0 = arith.constant 0 : i32
    %c0_i32_1 = arith.constant 0 : i32
    return %c0_i32, %c0_i32_0 : i32, i32
  }
  func.func @transform_1(%arg0: i32) -> (i32, i32) {
    %c0_i32 = arith.constant 0 : i32
    %c0_i32_0 = arith.constant 0 : i32
    %c0_i32_1 = arith.constant 0 : i32
    return %c0_i32, %c0_i32_0 : i32, i32
  }
  func.func @transform_2(%arg0: i32) -> (i32, i32, i32) {
    %c0_i32 = arith.constant 0 : i32
    %c0_i32_0 = arith.constant 0 : i32
    %c0_i32_1 = arith.constant 0 : i32
    %c0_i32_2 = arith.constant 0 : i32
    return %c0_i32, %c0_i32_0, %c0_i32_1 : i32, i32, i32
  }
  func.func @transform_3(%arg0: i32) -> (i32, i32, i32) {
    %c0_i32 = arith.constant 0 : i32
    %c0_i32_0 = arith.constant 0 : i32
    %c0_i32_1 = arith.constant 0 : i32
    %c0_i32_2 = arith.constant 0 : i32
    return %c0_i32, %c0_i32_0, %c0_i32_1 : i32, i32, i32
  }
  func.func @transform_4(%arg0: i32) -> (i32, i32, i32) {
    %c0_i32 = arith.constant 0 : i32
    %c0_i32_0 = arith.constant 0 : i32
    %c0_i32_1 = arith.constant 0 : i32
    %c0_i32_2 = arith.constant 0 : i32
    return %c0_i32, %c0_i32_0, %c0_i32_1 : i32, i32, i32
  }
  func.func @transform_5(%arg0: i32) -> (i32, i32) {
    %c0_i32 = arith.constant 0 : i32
    %c0_i32_0 = arith.constant 0 : i32
    %c0_i32_1 = arith.constant 0 : i32
    return %c0_i32, %c0_i32_0 : i32, i32
  }
  func.func @transform_6(%arg0: i32) -> (i32, i32) {
    %c0_i32 = arith.constant 0 : i32
    %c0_i32_0 = arith.constant 0 : i32
    %c0_i32_1 = arith.constant 0 : i32
    return %c0_i32, %c0_i32_0 : i32, i32
  }
  func.func @transform_7(%arg0: i32) -> (i32, i32) {
    %c0_i32 = arith.constant 0 : i32
    %c0_i32_0 = arith.constant 0 : i32
    %c0_i32_1 = arith.constant 0 : i32
    return %c0_i32, %c0_i32_0 : i32, i32
  }
  func.func @transform_8(%arg0: i32) -> (i32, i32, i32) {
    %c0_i32 = arith.constant 0 : i32
    %c0_i32_0 = arith.constant 0 : i32
    %c0_i32_1 = arith.constant 0 : i32
    %c0_i32_2 = arith.constant 0 : i32
    return %c0_i32, %c0_i32_0, %c0_i32_1 : i32, i32, i32
  }
  func.func @transform_9(%arg0: i32) -> (i32, i32, i32) {
    %c0_i32 = arith.constant 0 : i32
    %c0_i32_0 = arith.constant 0 : i32
    %c0_i32_1 = arith.constant 0 : i32
    %c0_i32_2 = arith.constant 0 : i32
    return %c0_i32, %c0_i32_0, %c0_i32_1 : i32, i32, i32
  }
}

</mosaic_0001>

<bundles_post_ra>
// kernel: tpu_custom_call.1
= control target key start
LH: loop header
LB: loop body
LE: loop exit
PB: predicated region body
PF: predicated region fallthrough
CT: control target
= control target key end

     0   :  { %15 = vsyncpa [#allocation3], 0  ;;  %s2924_s0 = inlined_call_operand.vmem [shape: f32[64,16], index: 0, kind: input, shape index: {}]   ;;  %s2925_s1 = inlined_call_operand.vmem [shape: f32[16,128], index: 1, kind: input, shape index: {}]   ;;  %s2926_s2 = inlined_call_operand.vmem [shape: f32[2,32,128], index: 2, kind: input, shape index: {}]   ;;  %s2927_s3 = inlined_call_operand.hbm [shape: f32[3,32,128], index: 3, kind: input, shape index: {}]   ;;  %s2928_s4 = inlined_call_operand.vmem [shape: f32[3,1,128], index: 4, kind: input, shape index: {}]   ;;  %s2929_s5 = inlined_call_operand.hbm [shape: f32[32,128], index: 5, kind: input, shape index: {}]   ;;  %s2930_s6 = inlined_call_operand.vmem [shape: f32[1,128], index: 6, kind: input, shape index: {}]   ;;  %s2931_s7 = inlined_call_operand.hbm [shape: f32[64,128], index: 7, kind: output, shape index: {0}]   ;;  %s2932_s8 = inlined_call_operand.hbm [shape: f32[3,8,32], index: 8, kind: output, shape index: {1}]   ;;  %s2933_s9 = inlined_call_operand.hbm [shape: f32[3,8,32], index: 9, kind: output, shape index: {2}]  }
   0x1   :  { %16 = vsyncpa [#allocation6], 0 }
   0x2   :  { %17 = vsyncpa [#allocation4], 0 }
   0x3   :  { %18 = vsyncpa [#allocation9], 0  ;;  %s29_s11 = sshll.u32 %s2927_s3, 4  ;;  %s2357_s12 = smov [#allocation2]   ;;  %s30_s11 = int_to_ptr.hbm [resolvable:$true] %s29_s11 }
   0x4   :  { %s31_s13 = sshll.u32 %s2357_s12, 4  ;;  %s44_s16 = sshll.u32 %s2929_s5, 4  ;;  %s32_s13 = int_to_ptr.vmem [resolvable:$true] %s31_s13  ;;  %s45_s16 = int_to_ptr.hbm [resolvable:$true] %s44_s16 }
   0x5   :  { %s2358_s17 = smov 128   ;;  %s2359_s18 = smov 8  }
   0x6   :  { %37 = dma.hbm_to_vmem [thread:$0]  %s30_s11, 1536, %s32_s13, [#allocation3], %s2358_s17, %s2358_s17, %s2359_s18  }
   0x7   :  { %s2360_s19 = smov [#allocation5]  }
   0x8   :  { %s46_s20 = sshll.u32 %s2360_s19, 4  ;;  %s47_s20 = int_to_ptr.vmem [resolvable:$true] %s46_s20 }
   0x9   :  { %52 = dma.hbm_to_vmem [thread:$0]  %s45_s16, 512, %s47_s20, [#allocation6], %s2358_s17, %s2358_s17, %s2359_s18  }
   0xa   :  { %2349 = dma.done.wait [#allocation3], 1536  }
   0xb   :  { %2350 = vsyncadd [#allocation3], 4294965760 }
   0xc   :  { %2351 = dma.done.wait [#allocation6], 512  }
   0xd   :  { %2352 = vsyncadd [#allocation6], 4294966784  ;;  %v2430_v0 = vld [vmem:[#allocation2 + $0x18] sm:$0xff]  ;;  %v2432_v1 = vld [vmem:[#allocation2 + $0x10] sm:$0xff]  ;;  %vm73_vm0 = vcmask 130048   ;;  %v2361_v7 = vmov 0.0  }
   0xe   :  { %163 = vmatpush.msra.mxu3 %v2430_v0  ;;  %v2435_v2 = vld [vmem:[#allocation2 + $0x8] sm:$0xff]  ;;  %v71_v4 = vld [vmem:[%s2925_s1] sm:$0xff]  ;;  %355 = vmatpush.msra.mxu1 %v2430_v0  ;;  %s2362_s26 = smov 64   ;;  %s2363_s27 = smov 32   ;;  %vm147_vm5 = vcmask 261120   ;;  %v65_v63 = vld [vmem:[%s2924_s0 + $0x10] sm:$0xff] }
   0xf   :  { %v72_v3 = vld [vmem:[%s2925_s1 + $0x8] sm:$0xff]  ;;  %v63_v5 = vld [vmem:[%s2924_s0] sm:$0xff]  ;;  %s2365_s23 = smov [#allocation8]   ;;  %s1899_s28 = sshll.u32 %s2932_s8, 4  ;;  %s1900_s28 = int_to_ptr.hbm [resolvable:$true] %s1899_s28 }
  0x10   :  { %112 = vmatpush.msra.mxu0 %v72_v3  ;;  %2018 = vmatpush.msra.mxu2 %v72_v3  ;;  %v2449_v6 = vld [vmem:[#allocation2] sm:$0xff]  ;;  %v64_v35 = vld [vmem:[%s2924_s0 + $0x8] sm:$0xff]  ;;  %s1897_s24 = sshll.u32 %s2365_s23, 4  ;;  %s1912_s10 = sshll.u32 %s2933_s9, 4  ;;  %s1898_s24 = int_to_ptr.vmem [resolvable:$true] %s1897_s24  ;;  %s1913_s10 = int_to_ptr.hbm [resolvable:$true] %s1912_s10 }
  0x11   :  { %164 = vmatpush.msra.mxu3 %v2432_v1  ;;  %356 = vmatpush.msra.mxu1 %v2432_v1  ;;  %v2476_v9 = vld [vmem:[%s2928_s4] ss:$0 sm:$0xff]  ;;  %s2367_s8 = smov [#allocation7]   ;;  %s1886_s14 = sshll.u32 %s2931_s7, 4  ;;  %s1887_s14 = int_to_ptr.hbm [resolvable:$true] %s1886_s14 }
  0x12   :  { %113 = vmatpush.msra.mxu0 %v71_v4  ;;  %2019 = vmatpush.msra.mxu2 %v71_v4  ;;  %s1884_s11 = sshll.u32 %s2367_s8, 4  ;;  %s1885_s11 = int_to_ptr.vmem [resolvable:$true] %s1884_s11 }
  0x13   :  { %165 = vmatpush.msra.mxu3 %v2435_v2  ;;  %1935 = vmatmul.msk.f32.vlgmr.msra.gmra.mxu0 %vm73_vm0, %v63_v5 }
  0x14   :  { %357 = vmatpush.msra.mxu1 %v2435_v2  ;;  %419 = vmatpush.msrb.mxu2 %v2430_v0 }
  0x15   :  { %166 = vmatpush.msra.mxu3 %v2449_v6 }
  0x16   :  { %167 = vmatmul.f32.vlgmr.msra.gmra.mxu3 %v2361_v7  ;;  %358 = vmatpush.msra.mxu1 %v2449_v6 }
  0x17   :  { %227 = vmatpush.msrb.mxu3 %v2430_v0  ;;  %420 = vmatpush.msrb.mxu2 %v2432_v1 }
  0x18   :  { %547 = vmatpush.msrb.mxu1 %v2430_v0 }
  0x19   :  { %228 = vmatpush.msrb.mxu3 %v2432_v1  ;;  %421 = vmatpush.msrb.mxu2 %v2435_v2 }
  0x1a   :  { %548 = vmatpush.msrb.mxu1 %v2432_v1 }
  0x1b   :  { %229 = vmatpush.msrb.mxu3 %v2435_v2  ;;  %422 = vmatpush.msrb.mxu2 %v2449_v6 }
  0x1c   :  { %549 = vmatpush.msrb.mxu1 %v2435_v2  ;;  %1936 = vmatmul.msk.f32.gmra.mxu0 %vm73_vm0, %v64_v35 }
  0x1d   :  { %230 = vmatpush.msrb.mxu3 %v2449_v6 }
  0x1e   :  { %550 = vmatpush.msrb.mxu1 %v2449_v6 }
  0x1f   :  { %291 = vmatpush.msra.mxu3 %v2430_v0 }
  0x21   :  { %292 = vmatpush.msra.mxu3 %v2432_v1 }
  0x23   :  { %293 = vmatpush.msra.mxu3 %v2435_v2 }
  0x24   :  { %1937 = vmatmul.msk.f32.gmra.mxu0 %vm73_vm0, %v65_v63 }
  0x25   :  { %294 = vmatpush.msra.mxu3 %v2449_v6 }
  0x90   :  { %v115_v8 = vpop.f32.mrf.mxu0 }
  0x99   :  { %v168_v10 = vpop.f32.mrf.mxu3  ;;  %v118_v37 = vpop.f32.mrf.mxu0 }
  0x9a   :  { %v171_v11 = vadd.f32 %v168_v10, %v115_v8 }
  0x9c   :  { %v172_v12 = vadd.f32 %v2476_v9, %v171_v11 }
  0x9e   :  { %2035 = vtanh.f32 %v172_v12  ;;  %v1943_v14 = vmul.f32 -1.442695, %v172_v12 }
  0xa0   :  { %2037 = vpow2.f32 %v1943_v14 }
  0xa1   :  { %v121_v4 = vpop.f32.mrf.mxu0 }
  0xa4   :  { %v2036_v13 = vpop.eup %2035 }
  0xa5   :  { %195 = vrot.lane.b32.xlu0 %v2036_v13, %s2362_s26 }
  0xa6   :  { %v2038_v15 = vpop.eup %2037 }
  0xa7   :  { %v176_v16 = vadd.f32 1.0, %v2038_v15 }
  0xa9   :  { %2039 = vrcp.f32 %v176_v16  ;;  %v188_v22 = vand.u32 2147483648, %v176_v16  ;;  %vm182_vm2 = vweird.f32 %v176_v16  ;;  %v186_v23 = vand.u32 2147483647, %v176_v16 }
  0xab   :  { %v189_v25 = vor.u32 1.1754944e-38, %v188_v22  ;;  %vm187_vm4 = vcmp.eq.f32.partialorder %v186_v23, 8.507059e+37 }
  0xaf   :  { %v2040_v17 = vpop.eup %2039 }
  0xb0   :  { %v178_v18 = vmul.f32 %v2040_v17, %v176_v16  ;;  %vm183_vm1 = vweird.f32 %v2040_v17 }
  0xb1   :  { %vm184_vm3 = vmor %vm182_vm2, %vm183_vm1 }
  0xb2   :  { %v179_v19 = vsub.f32 1.0, %v178_v18 }
  0xb4   :  { %v180_v20 = vmul.f32 %v2040_v17, %v179_v19 }
  0xb6   :  { %v181_v21 = vadd.f32 %v2040_v17, %v180_v20 }
  0xb8   :  { %v185_v24 = vsel %vm184_vm3, %v2040_v17, %v181_v21 }
  0xb9   :  { %v190_v27 = vsel %vm187_vm4, %v189_v25, %v185_v24 }
  0xba   :  { %v193_v29 = vmul.f32 0.0, %v190_v27 }
 0x117   :  { %v196_v26 = vpop.permute.xlu0 %195 }
 0x118   :  { %v198_v28 = vmul.f32 %v196_v26, %v190_v27 }
 0x11a   :  { %200 = vrot.lane.b32.xlu0 %v198_v28, %s2363_s27 }
 0x18c   :  { %v201_v30 = vpop.permute.xlu0 %200 }
 0x18d   :  { %v203_v31 = vadd.f32 %v201_v30, %v193_v29 }
 0x18f   :  { %2041 = vtanh.f32 %v203_v31 }
 0x195   :  { %v2042_v32 = vpop.eup %2041 }
 0x196   :  { %206 = vrot.lane.b32.xlu1 %v2042_v32, %s2362_s26 }
 0x208   :  { %v207_v33 = vpop.permute.xlu1 %206 }
 0x209   :  { %v209_v34 = vmul.f32 %v207_v33, %v190_v27  ;;  %v66_v33 = vld [vmem:[%s2924_s0 + $0x18] sm:$0xff] }
 0x20a   :  { %1938 = vmatmul.msk.f32.gmra.mxu0 %vm73_vm0, %v66_v33 }
 0x20b   :  { %211 = vrot.lane.b32.xlu1 %v209_v34, %s2363_s27 }
 0x27d   :  { %v2487_v36 = vpop.permute.xlu1 %211 }
 0x27e   :  { %1944 = vmatmul.msk.f32.vlgmr.msrb.gmra.mxu3 %vm147_vm5, %v2487_v36 }
 0x27f   :  { %483 = vmatpush.msrb.mxu3 %v2430_v0 }
 0x281   :  { %484 = vmatpush.msrb.mxu3 %v2432_v1 }
 0x283   :  { %485 = vmatpush.msrb.mxu3 %v2435_v2 }
 0x285   :  { %486 = vmatpush.msrb.mxu3 %v2449_v6 }
 0x287   :  { %v124_v35 = vpop.f32.mrf.mxu0 }
 0x301   :  { %v232_v38 = vpop.f32.mrf.mxu3 }
 0x302   :  { %v235_v39 = vadd.f32 %v232_v38, %v118_v37 }
 0x304   :  { %v236_v40 = vadd.f32 %v2476_v9, %v235_v39 }
 0x306   :  { %2043 = vtanh.f32 %v236_v40  ;;  %v1945_v42 = vmul.f32 -1.442695, %v236_v40 }
 0x308   :  { %2045 = vpow2.f32 %v1945_v42 }
 0x30c   :  { %v2044_v41 = vpop.eup %2043 }
 0x30d   :  { %259 = vrot.lane.b32.xlu2 %v2044_v41, %s2362_s26 }
 0x30e   :  { %v2046_v43 = vpop.eup %2045 }
 0x30f   :  { %v240_v44 = vadd.f32 1.0, %v2046_v43 }
 0x311   :  { %2047 = vrcp.f32 %v240_v44  ;;  %v252_v50 = vand.u32 2147483648, %v240_v44  ;;  %vm246_vm7 = vweird.f32 %v240_v44  ;;  %v250_v51 = vand.u32 2147483647, %v240_v44 }
 0x313   :  { %v253_v53 = vor.u32 1.1754944e-38, %v252_v50  ;;  %vm251_vm9 = vcmp.eq.f32.partialorder %v250_v51, 8.507059e+37 }
 0x317   :  { %v2048_v45 = vpop.eup %2047 }
 0x318   :  { %v242_v46 = vmul.f32 %v2048_v45, %v240_v44  ;;  %vm247_vm6 = vweird.f32 %v2048_v45 }
 0x319   :  { %vm248_vm8 = vmor %vm246_vm7, %vm247_vm6 }
 0x31a   :  { %v243_v47 = vsub.f32 1.0, %v242_v46 }
 0x31c   :  { %v244_v48 = vmul.f32 %v2048_v45, %v243_v47 }
 0x31e   :  { %v245_v49 = vadd.f32 %v2048_v45, %v244_v48 }
 0x320   :  { %v249_v52 = vsel %vm248_vm8, %v2048_v45, %v245_v49 }
 0x321   :  { %v254_v55 = vsel %vm251_vm9, %v253_v53, %v249_v52 }
 0x322   :  { %v257_v57 = vmul.f32 %v254_v55, %v203_v31 }
 0x367   :  { %v260_v54 = vpop.permute.xlu2 %259 }
 0x368   :  { %v262_v56 = vmul.f32 %v260_v54, %v254_v55 }
 0x36a   :  { %264 = vrot.lane.b32.xlu2 %v262_v56, %s2363_s27 }
 0x3c4   :  { %v265_v58 = vpop.permute.xlu2 %264 }
 0x3c5   :  { %v267_v59 = vadd.f32 %v265_v58, %v257_v57 }
 0x3c7   :  { %2049 = vtanh.f32 %v267_v59 }
 0x3cd   :  { %v2050_v60 = vpop.eup %2049 }
 0x3ce   :  { %270 = vrot.lane.b32.xlu0 %v2050_v60, %s2362_s26  ;;  %v67_v60 = vld [vmem:[%s2924_s0 + $0x20] sm:$0xff] }
 0x3cf   :  { %1939 = vmatmul.msk.f32.vlgmr.msra.gmra.mxu2 %vm73_vm0, %v67_v60 }
 0x3d0   :  { %611 = vmatpush.msra.mxu2 %v2430_v0  ;;  %v70_v0 = vld [vmem:[%s2924_s0 + $0x38] sm:$0xff] }
 0x3d2   :  { %612 = vmatpush.msra.mxu2 %v2432_v1 }
 0x3d4   :  { %613 = vmatpush.msra.mxu2 %v2435_v2 }
 0x3d6   :  { %614 = vmatpush.msra.mxu2 %v2449_v6 }
 0x440   :  { %v271_v61 = vpop.permute.xlu0 %270 }
 0x441   :  { %v273_v62 = vmul.f32 %v271_v61, %v254_v55  ;;  %v68_v61 = vld [vmem:[%s2924_s0 + $0x28] sm:$0xff] }
 0x442   :  { %1940 = vmatmul.msk.f32.gmra.mxu2 %vm73_vm0, %v68_v61 }
 0x443   :  { %275 = vrot.lane.b32.xlu1 %v273_v62, %s2363_s27  ;;  %v69_v62 = vld [vmem:[%s2924_s0 + $0x30] sm:$0xff] }
 0x44a   :  { %1941 = vmatmul.msk.f32.gmra.mxu2 %vm73_vm0, %v69_v62 }
 0x452   :  { %1942 = vmatmul.msk.f32.gmra.mxu2 %vm73_vm0, %v70_v0  ;;  %v127_v6 = vpop.f32.mrf.mxu2 }
 0x4b5   :  { %v2504_v3 = vpop.permute.xlu1 %275 }
 0x4b6   :  { %1946 = vmatmul.msk.f32.vlgmr.msra.gmra.mxu3 %vm147_vm5, %v2504_v3 }
 0x539   :  { %v296_v5 = vpop.f32.mrf.mxu3 }
 0x53a   :  { %v299_v8 = vadd.f32 %v296_v5, %v121_v4  ;;  %v130_v4 = vpop.f32.mrf.mxu2 }
 0x53c   :  { %v300_v10 = vadd.f32 %v2476_v9, %v299_v8 }
 0x53e   :  { %2051 = vtanh.f32 %v300_v10  ;;  %v1947_v12 = vmul.f32 -1.442695, %v300_v10 }
 0x540   :  { %2053 = vpow2.f32 %v1947_v12 }
 0x542   :  { %v2547_v5 = vpop.f32.mrf.mxu2 }
 0x544   :  { %v2052_v11 = vpop.eup %2051 }
 0x545   :  { %323 = vrot.lane.b32.xlu2 %v2052_v11, %s2362_s26 }
 0x546   :  { %v2054_v13 = vpop.eup %2053 }
 0x547   :  { %v304_v14 = vadd.f32 1.0, %v2054_v13 }
 0x549   :  { %2055 = vrcp.f32 %v304_v14  ;;  %v316_v20 = vand.u32 2147483648, %v304_v14  ;;  %vm310_vm11 = vweird.f32 %v304_v14  ;;  %v314_v21 = vand.u32 2147483647, %v304_v14 }
 0x54a   :  { %v2549_v8 = vpop.f32.mrf.mxu2 }
 0x54b   :  { %v317_v23 = vor.u32 1.1754944e-38, %v316_v20  ;;  %vm315_vm13 = vcmp.eq.f32.partialorder %v314_v21, 8.507059e+37 }
 0x54f   :  { %v2056_v15 = vpop.eup %2055 }
 0x550   :  { %v306_v16 = vmul.f32 %v2056_v15, %v304_v14  ;;  %vm311_vm10 = vweird.f32 %v2056_v15 }
 0x551   :  { %vm312_vm12 = vmor %vm310_vm11, %vm311_vm10 }
 0x552   :  { %v307_v17 = vsub.f32 1.0, %v306_v16 }
 0x554   :  { %v308_v18 = vmul.f32 %v2056_v15, %v307_v17 }
 0x556   :  { %v309_v19 = vadd.f32 %v2056_v15, %v308_v18 }
 0x558   :  { %v313_v22 = vsel %vm312_vm12, %v2056_v15, %v309_v19 }
 0x559   :  { %v318_v25 = vsel %vm315_vm13, %v317_v23, %v313_v22 }
 0x55a   :  { %v321_v27 = vmul.f32 %v318_v25, %v267_v59 }
 0x59f   :  { %v324_v24 = vpop.permute.xlu2 %323 }
 0x5a0   :  { %v326_v26 = vmul.f32 %v324_v24, %v318_v25 }
 0x5a2   :  { %328 = vrot.lane.b32.xlu0 %v326_v26, %s2363_s27 }
 0x614   :  { %v329_v28 = vpop.permute.xlu0 %328 }
 0x615   :  { %v331_v29 = vadd.f32 %v329_v28, %v321_v27 }
 0x617   :  { %2057 = vtanh.f32 %v331_v29 }
 0x61d   :  { %v2058_v30 = vpop.eup %2057 }
 0x61e   :  { %334 = vrot.lane.b32.xlu1 %v2058_v30, %s2362_s26 }
 0x690   :  { %v335_v31 = vpop.permute.xlu1 %334 }
 0x691   :  { %v337_v32 = vmul.f32 %v335_v31, %v318_v25 }
 0x693   :  { %339 = vrot.lane.b32.xlu2 %v337_v32, %s2363_s27 }
 0x6ed   :  { %v2517_v34 = vpop.permute.xlu2 %339 }
 0x6ee   :  { %1948 = vmatmul.msk.f32.vlgmr.msra.gmra.mxu1 %vm147_vm5, %v2517_v34 }
 0x76b   :  { %v360_v37 = vpop.f32.mrf.mxu1 }
 0x76c   :  { %v363_v38 = vadd.f32 %v360_v37, %v124_v35  ;;  %v671_v37 = vld [vmem:[%s2926_s2 + $0x18] sm:$0xff] }
 0x76d   :  { %686 = vmatpush.msra.mxu3 %v671_v37 }
 0x76e   :  { %v364_v39 = vadd.f32 %v2476_v9, %v363_v38  ;;  %v670_v38 = vld [vmem:[%s2926_s2 + $0x10] sm:$0xff] }
 0x76f   :  { %687 = vmatpush.msra.mxu3 %v670_v38 }
 0x770   :  { %2059 = vtanh.f32 %v364_v39  ;;  %v1949_v41 = vmul.f32 -1.442695, %v364_v39  ;;  %v669_v39 = vld [vmem:[%s2926_s2 + $0x8] sm:$0xff] }
 0x771   :  { %688 = vmatpush.msra.mxu3 %v669_v39 }
 0x772   :  { %2061 = vpow2.f32 %v1949_v41 }
 0x776   :  { %v2060_v40 = vpop.eup %2059 }
 0x777   :  { %387 = vrot.lane.b32.xlu0 %v2060_v40, %s2362_s26  ;;  %v668_v40 = vld [vmem:[%s2926_s2] sm:$0xff] }
 0x778   :  { %v2062_v42 = vpop.eup %2061  ;;  %689 = vmatpush.msra.mxu3 %v668_v40 }
 0x779   :  { %v368_v43 = vadd.f32 1.0, %v2062_v42 }
 0x77b   :  { %2063 = vrcp.f32 %v368_v43  ;;  %v380_v49 = vand.u32 2147483648, %v368_v43  ;;  %vm374_vm15 = vweird.f32 %v368_v43  ;;  %v378_v50 = vand.u32 2147483647, %v368_v43 }
 0x77d   :  { %v381_v52 = vor.u32 1.1754944e-38, %v380_v49  ;;  %vm379_vm2 = vcmp.eq.f32.partialorder %v378_v50, 8.507059e+37 }
 0x781   :  { %v2064_v44 = vpop.eup %2063 }
 0x782   :  { %v370_v45 = vmul.f32 %v2064_v44, %v368_v43  ;;  %vm375_vm14 = vweird.f32 %v2064_v44 }
 0x783   :  { %vm376_vm1 = vmor %vm374_vm15, %vm375_vm14 }
 0x784   :  { %v371_v46 = vsub.f32 1.0, %v370_v45 }
 0x786   :  { %v372_v47 = vmul.f32 %v2064_v44, %v371_v46 }
 0x788   :  { %v373_v48 = vadd.f32 %v2064_v44, %v372_v47 }
 0x78a   :  { %v377_v51 = vsel %vm376_vm1, %v2064_v44, %v373_v48 }
 0x78b   :  { %v382_v54 = vsel %vm379_vm2, %v381_v52, %v377_v51 }
 0x78c   :  { %v385_v56 = vmul.f32 %v382_v54, %v331_v29 }
 0x7e9   :  { %v388_v53 = vpop.permute.xlu0 %387 }
 0x7ea   :  { %v390_v55 = vmul.f32 %v388_v53, %v382_v54 }
 0x7ec   :  { %392 = vrot.lane.b32.xlu1 %v390_v55, %s2363_s27 }
 0x85e   :  { %v393_v57 = vpop.permute.xlu1 %392 }
 0x85f   :  { %v395_v58 = vadd.f32 %v393_v57, %v385_v56 }
 0x861   :  { %2065 = vtanh.f32 %v395_v58 }
 0x867   :  { %v2066_v59 = vpop.eup %2065 }
 0x868   :  { %398 = vrot.lane.b32.xlu2 %v2066_v59, %s2362_s26 }
 0x8c2   :  { %v399_v1 = vpop.permute.xlu2 %398 }
 0x8c3   :  { %v401_v63 = vmul.f32 %v399_v1, %v382_v54  ;;  %v2585_v1 = vld [vmem:[#allocation2 + $0x38] sm:$0xff] }
 0x8c4   :  { %737 = vmatpush.msra.mxu1 %v2585_v1 }
 0x8c5   :  { %403 = vrot.lane.b32.xlu0 %v401_v63, %s2363_s27  ;;  %v2587_v63 = vld [vmem:[#allocation2 + $0x30] sm:$0xff] }
 0x8c6   :  { %738 = vmatpush.msra.mxu1 %v2587_v63 }
 0x937   :  { %v404_v2 = vpop.permute.xlu0 %403 }
 0x938   :  { %1950 = vmatmul.msk.f32.vlgmr.msrb.gmra.mxu2 %vm147_vm5, %v404_v2 }
 0x939   :  { %801 = vmatpush.msrb.mxu2 %v2585_v1 }
 0x93b   :  { %802 = vmatpush.msrb.mxu2 %v2587_v63 }
 0x9bb   :  { %v424_v10 = vpop.f32.mrf.mxu2 }
 0x9bc   :  { %v427_v11 = vadd.f32 %v424_v10, %v127_v6  ;;  %v2595_v6 = vld [vmem:[#allocation2 + $0x20] sm:$0xff] }
 0x9be   :  { %v428_v12 = vadd.f32 %v2476_v9, %v427_v11 }
 0x9c0   :  { %2067 = vtanh.f32 %v428_v12  ;;  %v1951_v14 = vmul.f32 -1.442695, %v428_v12 }
 0x9c2   :  { %2069 = vpow2.f32 %v1951_v14 }
 0x9c6   :  { %v2068_v13 = vpop.eup %2067 }
 0x9c7   :  { %451 = vrot.lane.b32.xlu1 %v2068_v13, %s2362_s26  ;;  %v2617_v13 = vld [vmem:[%s2928_s4 + $0x1] ss:$0 sm:$0xff] }
 0x9c8   :  { %v2070_v15 = vpop.eup %2069 }
 0x9c9   :  { %v432_v16 = vadd.f32 1.0, %v2070_v15 }
 0x9cb   :  { %2071 = vrcp.f32 %v432_v16  ;;  %v444_v22 = vand.u32 2147483648, %v432_v16  ;;  %vm438_vm3 = vweird.f32 %v432_v16  ;;  %v442_v23 = vand.u32 2147483647, %v432_v16 }
 0x9cd   :  { %v445_v25 = vor.u32 1.1754944e-38, %v444_v22  ;;  %vm443_vm6 = vcmp.eq.f32.partialorder %v442_v23, 8.507059e+37 }
 0x9d1   :  { %v2072_v17 = vpop.eup %2071 }
 0x9d2   :  { %v434_v18 = vmul.f32 %v2072_v17, %v432_v16  ;;  %vm439_vm0 = vweird.f32 %v2072_v17 }
 0x9d3   :  { %vm440_vm4 = vmor %vm438_vm3, %vm439_vm0 }
 0x9d4   :  { %v435_v19 = vsub.f32 1.0, %v434_v18 }
 0x9d6   :  { %v436_v20 = vmul.f32 %v2072_v17, %v435_v19 }
 0x9d8   :  { %v437_v21 = vadd.f32 %v2072_v17, %v436_v20 }
 0x9da   :  { %v441_v24 = vsel %vm440_vm4, %v2072_v17, %v437_v21 }
 0x9db   :  { %v446_v27 = vsel %vm443_vm6, %v445_v25, %v441_v24 }
 0x9dc   :  { %v449_v29 = vmul.f32 %v446_v27, %v395_v58 }
 0xa39   :  { %v452_v26 = vpop.permute.xlu1 %451 }
 0xa3a   :  { %v454_v28 = vmul.f32 %v452_v26, %v446_v27 }
 0xa3c   :  { %456 = vrot.lane.b32.xlu2 %v454_v28, %s2363_s27 }
 0xa96   :  { %v457_v30 = vpop.permute.xlu2 %456 }
 0xa97   :  { %v459_v31 = vadd.f32 %v457_v30, %v449_v29 }
 0xa99   :  { %2073 = vtanh.f32 %v459_v31 }
 0xa9f   :  { %v2074_v32 = vpop.eup %2073 }
 0xaa0   :  { %462 = vrot.lane.b32.xlu0 %v2074_v32, %s2362_s26 }
 0xb12   :  { %v463_v33 = vpop.permute.xlu0 %462 }
 0xb13   :  { %v465_v35 = vmul.f32 %v463_v33, %v446_v27 }
 0xb15   :  { %467 = vrot.lane.b32.xlu1 %v465_v35, %s2363_s27 }
 0xb87   :  { %v468_v41 = vpop.permute.xlu1 %467 }
 0xb88   :  { %1952 = vmatmul.msk.f32.vlgmr.msrb.gmra.mxu3 %vm147_vm5, %v468_v41 }
 0xb90   :  { %1958 = vmatmul.msk.f32.vlgmr.msra.gmra.mxu3 %vm147_vm5, %v2487_v36 }
 0xb98   :  { %1959 = vmatmul.msk.f32.gmra.mxu3 %vm147_vm5, %v2504_v3 }
 0xba0   :  { %1960 = vmatmul.msk.f32.gmra.mxu3 %vm147_vm5, %v2517_v34 }
 0xba8   :  { %1961 = vmatmul.msk.f32.gmra.mxu3 %vm147_vm5, %v404_v2  ;;  %v2591_v2 = vld [vmem:[#allocation2 + $0x28] sm:$0xff] }
 0xba9   :  { %739 = vmatpush.msra.mxu1 %v2591_v2  ;;  %803 = vmatpush.msrb.mxu2 %v2591_v2 }
 0xbab   :  { %740 = vmatpush.msra.mxu1 %v2595_v6  ;;  %804 = vmatpush.msrb.mxu2 %v2595_v6 }
 0xbb0   :  { %1962 = vmatmul.msk.f32.gmra.mxu3 %vm147_vm5, %v468_v41 }
 0xc0b   :  { %v488_v42 = vpop.f32.mrf.mxu3 }
 0xc0c   :  { %v491_v43 = vadd.f32 %v488_v42, %v130_v4 }
 0xc0e   :  { %v492_v44 = vadd.f32 %v2476_v9, %v491_v43 }
 0xc10   :  { %2075 = vtanh.f32 %v492_v44  ;;  %v1953_v46 = vmul.f32 -1.442695, %v492_v44 }
 0xc12   :  { %2077 = vpow2.f32 %v1953_v46 }
 0xc13   :  { %v691_v14 = vpop.f32.mrf.mxu3 }
 0xc16   :  { %v2076_v45 = vpop.eup %2075 }
 0xc17   :  { %515 = vrot.lane.b32.xlu2 %v2076_v45, %s2362_s26 }
 0xc18   :  { %v2078_v36 = vpop.eup %2077 }
 0xc19   :  { %v496_v47 = vadd.f32 1.0, %v2078_v36 }
 0xc1b   :  { %2079 = vrcp.f32 %v496_v47  ;;  %v508_v51 = vand.u32 2147483648, %v496_v47  ;;  %vm502_vm8 = vweird.f32 %v496_v47  ;;  %v506_v52 = vand.u32 2147483647, %v496_v47 }
 0xc1d   :  { %v509_v54 = vor.u32 1.1754944e-38, %v508_v51  ;;  %vm507_vm10 = vcmp.eq.f32.partialorder %v506_v52, 8.507059e+37 }
 0xc21   :  { %v2080_v3 = vpop.eup %2079 }
 0xc22   :  { %v498_v48 = vmul.f32 %v2080_v3, %v496_v47  ;;  %vm503_vm7 = vweird.f32 %v2080_v3 }
 0xc23   :  { %vm504_vm9 = vmor %vm502_vm8, %vm503_vm7 }
 0xc24   :  { %v499_v34 = vsub.f32 1.0, %v498_v48 }
 0xc26   :  { %v500_v49 = vmul.f32 %v2080_v3, %v499_v34 }
 0xc28   :  { %v501_v50 = vadd.f32 %v2080_v3, %v500_v49 }
 0xc2a   :  { %v505_v53 = vsel %vm504_vm9, %v2080_v3, %v501_v50 }
 0xc2b   :  { %v510_v56 = vsel %vm507_vm10, %v509_v54, %v505_v53 }
 0xc2c   :  { %v513_v58 = vmul.f32 %v510_v56, %v459_v31 }
 0xc71   :  { %v516_v55 = vpop.permute.xlu2 %515 }
 0xc72   :  { %v518_v57 = vmul.f32 %v516_v55, %v510_v56 }
 0xc74   :  { %520 = vrot.lane.b32.xlu0 %v518_v57, %s2363_s27 }
 0xce6   :  { %v521_v59 = vpop.permute.xlu0 %520 }
 0xce7   :  { %v2580_v60 = vadd.f32 %v521_v59, %v513_v58 }
 0xce9   :  { %2081 = vtanh.f32 %v2580_v60 }
 0xcef   :  { %v2082_v61 = vpop.eup %2081 }
 0xcf0   :  { %526 = vrot.lane.b32.xlu1 %v2082_v61, %s2362_s26 }
 0xd62   :  { %v527_v62 = vpop.permute.xlu1 %526 }
 0xd63   :  { %v529_v0 = vmul.f32 %v527_v62, %v510_v56  ;;  %v694_v62 = vpop.f32.mrf.mxu3 }
 0xd65   :  { %531 = vrot.lane.b32.xlu2 %v529_v0, %s2363_s27 }
 0xdbf   :  { %v532_v4 = vpop.permute.xlu2 %531 }
 0xdc0   :  { %1954 = vmatmul.msk.f32.vlgmr.msrb.gmra.mxu1 %vm147_vm5, %v532_v4  ;;  %1963 = vmatmul.msk.f32.gmra.mxu3 %vm147_vm5, %v532_v4 }
 0xdc1   :  { %865 = vmatpush.msrb.mxu1 %v2585_v1 }
 0xdc3   :  { %866 = vmatpush.msrb.mxu1 %v2587_v63 }
 0xdc5   :  { %867 = vmatpush.msrb.mxu1 %v2591_v2 }
 0xdc7   :  { %868 = vmatpush.msrb.mxu1 %v2595_v6 }
 0xdc8   :  { %741 = vmatmul.f32.vlgmr.msra.gmra.mxu1 %v2361_v7 }
 0xdc9   :  { %993 = vmatpush.msra.mxu1 %v2585_v1 }
 0xdcb   :  { %994 = vmatpush.msra.mxu1 %v2587_v63 }
 0xdcd   :  { %995 = vmatpush.msra.mxu1 %v2591_v2 }
 0xdcf   :  { %996 = vmatpush.msra.mxu1 %v2595_v6 }
 0xe3d   :  { %v552_v10 = vpop.f32.mrf.mxu1 }
 0xe3e   :  { %v555_v11 = vadd.f32 %v552_v10, %v2547_v5 }
 0xe40   :  { %v556_v12 = vadd.f32 %v2476_v9, %v555_v11 }
 0xe42   :  { %2083 = vtanh.f32 %v556_v12  ;;  %v1955_v5 = vmul.f32 -1.442695, %v556_v12 }
 0xe45   :  { %v742_v15 = vpop.f32.mrf.mxu1 }
 0xe46   :  { %v745_v16 = vadd.f32 %v742_v15, %v691_v14 }
 0xe48   :  { %v2084_v17 = vpop.eup %2083  ;;  %v746_v18 = vadd.f32 %v2617_v13, %v745_v16 }
 0xe49   :  { %579 = vrot.lane.b32.xlu0 %v2084_v17, %s2362_s26 }
 0xe4a   :  { %2085 = vtanh.f32 %v746_v18  ;;  %v1967_v9 = vmul.f32 -1.442695, %v746_v18 }
 0xe4b   :  { %2087 = vpow2.f32 %v1955_v5 }
 0xe4c   :  { %2089 = vpow2.f32 %v1967_v9 }
 0xe50   :  { %v2086_v19 = vpop.eup %2085 }
 0xe51   :  { %769 = vrot.lane.b32.xlu1 %v2086_v19, %s2362_s26  ;;  %v2088_v20 = vpop.eup %2087 }
 0xe52   :  { %v560_v21 = vadd.f32 1.0, %v2088_v20  ;;  %v2090_v22 = vpop.eup %2089 }
 0xe53   :  { %v750_v23 = vadd.f32 1.0, %v2090_v22 }
 0xe54   :  { %2091 = vrcp.f32 %v560_v21  ;;  %v572_v32 = vand.u32 2147483648, %v560_v21  ;;  %vm566_vm12 = vweird.f32 %v560_v21  ;;  %v570_v33 = vand.u32 2147483647, %v560_v21 }
 0xe55   :  { %2093 = vrcp.f32 %v750_v23  ;;  %v762_v43 = vand.u32 2147483648, %v750_v23  ;;  %vm756_vm1 = vweird.f32 %v750_v23  ;;  %v760_v44 = vand.u32 2147483647, %v750_v23 }
 0xe56   :  { %v573_v38 = vor.u32 1.1754944e-38, %v572_v32  ;;  %vm571_vm14 = vcmp.eq.f32.partialorder %v570_v33, 8.507059e+37  ;;  %v697_v33 = vpop.f32.mrf.mxu3 }
 0xe57   :  { %v763_v46 = vor.u32 1.1754944e-38, %v762_v43  ;;  %vm761_vm0 = vcmp.eq.f32.partialorder %v760_v44, 8.507059e+37 }
 0xe5a   :  { %v2092_v24 = vpop.eup %2091 }
 0xe5b   :  { %v562_v25 = vmul.f32 %v2092_v24, %v560_v21  ;;  %v2094_v27 = vpop.eup %2093  ;;  %vm567_vm11 = vweird.f32 %v2092_v24 }
 0xe5c   :  { %v752_v29 = vmul.f32 %v2094_v27, %v750_v23  ;;  %vm568_vm13 = vmor %vm566_vm12, %vm567_vm11  ;;  %vm757_vm15 = vweird.f32 %v2094_v27 }
 0xe5d   :  { %v563_v26 = vsub.f32 1.0, %v562_v25  ;;  %vm758_vm2 = vmor %vm756_vm1, %vm757_vm15 }
 0xe5e   :  { %v753_v31 = vsub.f32 1.0, %v752_v29 }
 0xe5f   :  { %v564_v28 = vmul.f32 %v2092_v24, %v563_v26 }
 0xe60   :  { %v754_v37 = vmul.f32 %v2094_v27, %v753_v31 }
 0xe61   :  { %v565_v30 = vadd.f32 %v2092_v24, %v564_v28 }
 0xe62   :  { %v755_v42 = vadd.f32 %v2094_v27, %v754_v37 }
 0xe63   :  { %v569_v35 = vsel %vm568_vm13, %v2092_v24, %v565_v30 }
 0xe64   :  { %v574_v40 = vsel %vm571_vm14, %v573_v38, %v569_v35  ;;  %v759_v45 = vsel %vm758_vm2, %v2094_v27, %v755_v42 }
 0xe65   :  { %v764_v47 = vsel %vm761_vm0, %v763_v46, %v759_v45  ;;  %v577_v48 = vmul.f32 %v574_v40, %v2580_v60 }
 0xe66   :  { %v767_v51 = vmul.f32 0.0, %v764_v47 }
 0xebb   :  { %v580_v39 = vpop.permute.xlu0 %579 }
 0xebc   :  { %v582_v41 = vmul.f32 %v580_v39, %v574_v40 }
 0xebe   :  { %584 = vrot.lane.b32.xlu2 %v582_v41, %s2363_s27 }
 0xec3   :  { %v770_v36 = vpop.permute.xlu1 %769 }
 0xec4   :  { %v772_v3 = vmul.f32 %v770_v36, %v764_v47 }
 0xec6   :  { %774 = vrot.lane.b32.xlu0 %v772_v3, %s2363_s27 }
 0xf18   :  { %v585_v34 = vpop.permute.xlu2 %584 }
 0xf19   :  { %v2625_v49 = vadd.f32 %v585_v34, %v577_v48 }
 0xf1b   :  { %2095 = vtanh.f32 %v2625_v49 }
 0xf21   :  { %v2096_v50 = vpop.eup %2095 }
 0xf22   :  { %590 = vrot.lane.b32.xlu1 %v2096_v50, %s2362_s26 }
 0xf38   :  { %v775_v52 = vpop.permute.xlu0 %774 }
 0xf39   :  { %v777_v53 = vadd.f32 %v775_v52, %v767_v51 }
 0xf3b   :  { %2097 = vtanh.f32 %v777_v53 }
 0xf41   :  { %v2098_v54 = vpop.eup %2097 }
 0xf42   :  { %780 = vrot.lane.b32.xlu2 %v2098_v54, %s2362_s26 }
 0xf94   :  { %v591_v55 = vpop.permute.xlu1 %590 }
 0xf95   :  { %v593_v56 = vmul.f32 %v591_v55, %v574_v40 }
 0xf97   :  { %595 = vrot.lane.b32.xlu0 %v593_v56, %s2363_s27 }
 0xf9c   :  { %v781_v57 = vpop.permute.xlu2 %780 }
 0xf9d   :  { %v783_v58 = vmul.f32 %v781_v57, %v764_v47 }
 0xf9f   :  { %785 = vrot.lane.b32.xlu1 %v783_v58, %s2363_s27 }
0x1009   :  { %v596_v59 = vpop.permute.xlu0 %595 }
0x100a   :  { %1956 = vmatmul.msk.f32.vlgmr.msra.gmra.mxu2 %vm147_vm5, %v596_v59  ;;  %1964 = vmatmul.msk.f32.gmra.mxu3 %vm147_vm5, %v596_v59 }
0x100b   :  { %929 = vmatpush.msra.mxu2 %v2585_v1 }
0x100d   :  { %930 = vmatpush.msra.mxu2 %v2587_v63 }
0x100f   :  { %931 = vmatpush.msra.mxu2 %v2591_v2 }
0x1011   :  { %v2637_v60 = vpop.permute.xlu1 %785  ;;  %932 = vmatpush.msra.mxu2 %v2595_v6 }
0x1012   :  { %1968 = vmatmul.msk.f32.vlgmr.msrb.gmra.mxu2 %vm147_vm5, %v2637_v60 }
0x1013   :  { %1057 = vmatpush.msrb.mxu2 %v2585_v1 }
0x1015   :  { %1058 = vmatpush.msrb.mxu2 %v2587_v63 }
0x1017   :  { %1059 = vmatpush.msrb.mxu2 %v2591_v2 }
0x1019   :  { %1060 = vmatpush.msrb.mxu2 %v2595_v6 }
0x108d   :  { %v2646_v61 = vpop.f32.mrf.mxu2 }
0x1095   :  { %v806_v0 = vpop.f32.mrf.mxu2 }
0x1096   :  { %v809_v4 = vadd.f32 %v806_v0, %v694_v62  ;;  %v700_v62 = vpop.f32.mrf.mxu3 }
0x1098   :  { %v810_v10 = vadd.f32 %v2617_v13, %v809_v4 }
0x109a   :  { %2099 = vtanh.f32 %v810_v10  ;;  %v1969_v12 = vmul.f32 -1.442695, %v810_v10 }
0x109c   :  { %2101 = vpow2.f32 %v1969_v12 }
0x10a0   :  { %v2100_v11 = vpop.eup %2099 }
0x10a1   :  { %833 = vrot.lane.b32.xlu2 %v2100_v11, %s2362_s26 }
0x10a2   :  { %v2102_v14 = vpop.eup %2101 }
0x10a3   :  { %v814_v15 = vadd.f32 1.0, %v2102_v14 }
0x10a5   :  { %2103 = vrcp.f32 %v814_v15  ;;  %v826_v9 = vand.u32 2147483648, %v814_v15  ;;  %vm820_vm4 = vweird.f32 %v814_v15  ;;  %v824_v20 = vand.u32 2147483647, %v814_v15 }
0x10a7   :  { %v827_v22 = vor.u32 1.1754944e-38, %v826_v9  ;;  %vm825_vm7 = vcmp.eq.f32.partialorder %v824_v20, 8.507059e+37 }
0x10ab   :  { %v2104_v16 = vpop.eup %2103 }
0x10ac   :  { %v816_v17 = vmul.f32 %v2104_v16, %v814_v15  ;;  %vm821_vm3 = vweird.f32 %v2104_v16 }
0x10ad   :  { %vm822_vm6 = vmor %vm820_vm4, %vm821_vm3 }
0x10ae   :  { %v817_v18 = vsub.f32 1.0, %v816_v17 }
0x10b0   :  { %v818_v19 = vmul.f32 %v2104_v16, %v817_v18 }
0x10b2   :  { %v819_v5 = vadd.f32 %v2104_v16, %v818_v19 }
0x10b4   :  { %v823_v21 = vsel %vm822_vm6, %v2104_v16, %v819_v5 }
0x10b5   :  { %v828_v24 = vsel %vm825_vm7, %v827_v22, %v823_v21 }
0x10b6   :  { %v831_v26 = vmul.f32 %v828_v24, %v777_v53 }
0x10fb   :  { %v834_v23 = vpop.permute.xlu2 %833 }
0x10fc   :  { %v836_v25 = vmul.f32 %v834_v23, %v828_v24 }
0x10fe   :  { %838 = vrot.lane.b32.xlu0 %v836_v25, %s2363_s27 }
0x1170   :  { %v839_v27 = vpop.permute.xlu0 %838 }
0x1171   :  { %v841_v28 = vadd.f32 %v839_v27, %v831_v26 }
0x1173   :  { %2105 = vtanh.f32 %v841_v28 }
0x1179   :  { %v2106_v29 = vpop.eup %2105 }
0x117a   :  { %844 = vrot.lane.b32.xlu1 %v2106_v29, %s2362_s26  ;;  %v703_v29 = vpop.f32.mrf.mxu3 }
0x11ec   :  { %v845_v30 = vpop.permute.xlu1 %844 }
0x11ed   :  { %v847_v31 = vmul.f32 %v845_v30, %v828_v24 }
0x11ef   :  { %849 = vrot.lane.b32.xlu2 %v847_v31, %s2363_s27 }
0x1249   :  { %v2653_v32 = vpop.permute.xlu2 %849 }
0x124a   :  { %1970 = vmatmul.msk.f32.vlgmr.msrb.gmra.mxu1 %vm147_vm5, %v2653_v32 }
0x124b   :  { %1121 = vmatpush.msrb.mxu1 %v2585_v1 }
0x124d   :  { %1122 = vmatpush.msrb.mxu1 %v2587_v63 }
0x124f   :  { %1123 = vmatpush.msrb.mxu1 %v2591_v2 }
0x1251   :  { %1124 = vmatpush.msrb.mxu1 %v2595_v6 }
0x12c7   :  { %v870_v35 = vpop.f32.mrf.mxu1 }
0x12c8   :  { %v873_v37 = vadd.f32 %v870_v35, %v697_v33 }
0x12ca   :  { %v874_v38 = vadd.f32 %v2617_v13, %v873_v37 }
0x12cc   :  { %2107 = vtanh.f32 %v874_v38  ;;  %v1971_v40 = vmul.f32 -1.442695, %v874_v38 }
0x12ce   :  { %2109 = vpow2.f32 %v1971_v40 }
0x12d2   :  { %v2108_v39 = vpop.eup %2107 }
0x12d3   :  { %897 = vrot.lane.b32.xlu0 %v2108_v39, %s2362_s26 }
0x12d4   :  { %v2110_v41 = vpop.eup %2109 }
0x12d5   :  { %v878_v42 = vadd.f32 1.0, %v2110_v41 }
0x12d7   :  { %2111 = vrcp.f32 %v878_v42  ;;  %v890_v47 = vand.u32 2147483648, %v878_v42  ;;  %vm884_vm9 = vweird.f32 %v878_v42  ;;  %v888_v3 = vand.u32 2147483647, %v878_v42 }
0x12d9   :  { %v891_v34 = vor.u32 1.1754944e-38, %v890_v47  ;;  %vm889_vm11 = vcmp.eq.f32.partialorder %v888_v3, 8.507059e+37 }
0x12dd   :  { %v2112_v43 = vpop.eup %2111 }
0x12de   :  { %v880_v44 = vmul.f32 %v2112_v43, %v878_v42  ;;  %vm885_vm8 = vweird.f32 %v2112_v43 }
0x12df   :  { %vm886_vm10 = vmor %vm884_vm9, %vm885_vm8 }
0x12e0   :  { %v881_v45 = vsub.f32 1.0, %v880_v44 }
0x12e2   :  { %v882_v46 = vmul.f32 %v2112_v43, %v881_v45 }
0x12e4   :  { %v883_v36 = vadd.f32 %v2112_v43, %v882_v46 }
0x12e6   :  { %v887_v48 = vsel %vm886_vm10, %v2112_v43, %v883_v36 }
0x12e7   :  { %v892_v51 = vsel %vm889_vm11, %v891_v34, %v887_v48 }
0x12e8   :  { %v895_v53 = vmul.f32 %v892_v51, %v841_v28 }
0x1345   :  { %v898_v50 = vpop.permute.xlu0 %897 }
0x1346   :  { %v900_v52 = vmul.f32 %v898_v50, %v892_v51 }
0x1348   :  { %902 = vrot.lane.b32.xlu1 %v900_v52, %s2363_s27 }
0x13ba   :  { %v903_v54 = vpop.permute.xlu1 %902 }
0x13bb   :  { %v905_v55 = vadd.f32 %v903_v54, %v895_v53 }
0x13bd   :  { %2113 = vtanh.f32 %v905_v55 }
0x13c3   :  { %v2114_v56 = vpop.eup %2113 }
0x13c4   :  { %908 = vrot.lane.b32.xlu2 %v2114_v56, %s2362_s26 }
0x141e   :  { %v909_v57 = vpop.permute.xlu2 %908 }
0x141f   :  { %v911_v58 = vmul.f32 %v909_v57, %v892_v51  ;;  %v706_v57 = vpop.f32.mrf.mxu3 }
0x1421   :  { %913 = vrot.lane.b32.xlu0 %v911_v58, %s2363_s27 }
0x1493   :  { %v2666_v59 = vpop.permute.xlu0 %913 }
0x1494   :  { %1972 = vmatmul.msk.f32.vlgmr.msra.gmra.mxu2 %vm147_vm5, %v2666_v59 }
0x1495   :  { %1185 = vmatpush.msra.mxu2 %v2585_v1 }
0x1497   :  { %1186 = vmatpush.msra.mxu2 %v2587_v63 }
0x1499   :  { %1187 = vmatpush.msra.mxu2 %v2591_v2 }
0x149b   :  { %1188 = vmatpush.msra.mxu2 %v2595_v6 }
0x1517   :  { %v934_v0 = vpop.f32.mrf.mxu2 }
0x1518   :  { %v937_v4 = vadd.f32 %v934_v0, %v700_v62 }
0x151a   :  { %v938_v10 = vadd.f32 %v2617_v13, %v937_v4 }
0x151c   :  { %2115 = vtanh.f32 %v938_v10  ;;  %v1973_v12 = vmul.f32 -1.442695, %v938_v10 }
0x151e   :  { %2117 = vpow2.f32 %v1973_v12 }
0x1522   :  { %v2116_v11 = vpop.eup %2115 }
0x1523   :  { %961 = vrot.lane.b32.xlu1 %v2116_v11, %s2362_s26 }
0x1524   :  { %v2118_v14 = vpop.eup %2117 }
0x1525   :  { %v942_v15 = vadd.f32 1.0, %v2118_v14 }
0x1527   :  { %2119 = vrcp.f32 %v942_v15  ;;  %v954_v6 = vand.u32 2147483648, %v942_v15  ;;  %vm948_vm13 = vweird.f32 %v942_v15  ;;  %v952_v18 = vand.u32 2147483647, %v942_v15 }
0x1529   :  { %v955_v5 = vor.u32 1.1754944e-38, %v954_v6  ;;  %vm953_vm15 = vcmp.eq.f32.partialorder %v952_v18, 8.507059e+37 }
0x152d   :  { %v2120_v1 = vpop.eup %2119 }
0x152e   :  { %v944_v63 = vmul.f32 %v2120_v1, %v942_v15  ;;  %vm949_vm12 = vweird.f32 %v2120_v1 }
0x152f   :  { %vm950_vm14 = vmor %vm948_vm13, %vm949_vm12 }
0x1530   :  { %v945_v16 = vsub.f32 1.0, %v944_v63 }
0x1532   :  { %v946_v2 = vmul.f32 %v2120_v1, %v945_v16 }
0x1534   :  { %v947_v17 = vadd.f32 %v2120_v1, %v946_v2 }
0x1536   :  { %v951_v19 = vsel %vm950_vm14, %v2120_v1, %v947_v17 }
0x1537   :  { %v956_v20 = vsel %vm953_vm15, %v955_v5, %v951_v19 }
0x1538   :  { %v959_v22 = vmul.f32 %v956_v20, %v905_v55 }
0x1595   :  { %v962_v9 = vpop.permute.xlu1 %961 }
0x1596   :  { %v964_v21 = vmul.f32 %v962_v9, %v956_v20 }
0x1598   :  { %966 = vrot.lane.b32.xlu2 %v964_v21, %s2363_s27 }
0x15f2   :  { %v967_v23 = vpop.permute.xlu2 %966 }
0x15f3   :  { %v969_v24 = vadd.f32 %v967_v23, %v959_v22 }
0x15f5   :  { %2121 = vtanh.f32 %v969_v24 }
0x15fb   :  { %v2122_v25 = vpop.eup %2121 }
0x15fc   :  { %972 = vrot.lane.b32.xlu0 %v2122_v25, %s2362_s26 }
0x166e   :  { %v973_v26 = vpop.permute.xlu0 %972 }
0x166f   :  { %v975_v27 = vmul.f32 %v973_v26, %v956_v20  ;;  %v1985_v26 = vld [vmem:[%s2926_s2 + $0x38] sm:$0xff] }
0x1671   :  { %977 = vrot.lane.b32.xlu1 %v975_v27, %s2363_s27  ;;  %v1984_v27 = vld [vmem:[%s2926_s2 + $0x30] sm:$0xff] }
0x16e3   :  { %v2679_v28 = vpop.permute.xlu1 %977 }
0x16e4   :  { %1974 = vmatmul.msk.f32.vlgmr.msra.gmra.mxu1 %vm147_vm5, %v2679_v28 }
0x16e5   :  { %1263 = vmatpush.msra.mxu1 %v1985_v26 }
0x16e7   :  { %1264 = vmatpush.msra.mxu1 %v1984_v27 }
0x1761   :  { %v998_v30 = vpop.f32.mrf.mxu1 }
0x1762   :  { %v1001_v31 = vadd.f32 %v998_v30, %v703_v29  ;;  %v1983_v29 = vld [vmem:[%s2926_s2 + $0x28] sm:$0xff]  ;;  %v1982_v30 = vld [vmem:[%s2926_s2 + $0x20] sm:$0xff] }
0x1763   :  { %1265 = vmatpush.msra.mxu1 %v1983_v29 }
0x1764   :  { %v1002_v33 = vadd.f32 %v2617_v13, %v1001_v31 }
0x1765   :  { %1266 = vmatpush.msra.mxu1 %v1982_v30 }
0x1766   :  { %2123 = vtanh.f32 %v1002_v33  ;;  %v1975_v37 = vmul.f32 -1.442695, %v1002_v33  ;;  %v709_v33 = vpop.f32.mrf.mxu3 }
0x1768   :  { %2125 = vpow2.f32 %v1975_v37 }
0x176c   :  { %v2124_v35 = vpop.eup %2123 }
0x176d   :  { %1025 = vrot.lane.b32.xlu2 %v2124_v35, %s2362_s26 }
0x176e   :  { %v2126_v38 = vpop.eup %2125 }
0x176f   :  { %v1006_v39 = vadd.f32 1.0, %v2126_v38 }
0x1771   :  { %2127 = vrcp.f32 %v1006_v39  ;;  %v1018_v45 = vand.u32 2147483648, %v1006_v39  ;;  %vm1012_vm2 = vweird.f32 %v1006_v39  ;;  %v1016_v46 = vand.u32 2147483647, %v1006_v39 }
0x1773   :  { %v1019_v47 = vor.u32 1.1754944e-38, %v1018_v45  ;;  %vm1017_vm3 = vcmp.eq.f32.partialorder %v1016_v46, 8.507059e+37 }
0x1777   :  { %v2128_v40 = vpop.eup %2127 }
0x1778   :  { %v1008_v41 = vmul.f32 %v2128_v40, %v1006_v39  ;;  %vm1013_vm1 = vweird.f32 %v2128_v40 }
0x1779   :  { %vm1014_vm0 = vmor %vm1012_vm2, %vm1013_vm1 }
0x177a   :  { %v1009_v42 = vsub.f32 1.0, %v1008_v41 }
0x177c   :  { %v1010_v43 = vmul.f32 %v2128_v40, %v1009_v42 }
0x177e   :  { %v1011_v44 = vadd.f32 %v2128_v40, %v1010_v43 }
0x1780   :  { %v1015_v36 = vsel %vm1014_vm0, %v2128_v40, %v1011_v44 }
0x1781   :  { %v1020_v48 = vsel %vm1017_vm3, %v1019_v47, %v1015_v36  ;;  %v2227_v47 = vld [vmem:[%s2928_s4] ss:$0 sm:$0xff] }
0x1782   :  { %v1023_v50 = vmul.f32 %v1020_v48, %v969_v24 }
0x17c7   :  { %v1026_v3 = vpop.permute.xlu2 %1025 }
0x17c8   :  { %v1028_v34 = vmul.f32 %v1026_v3, %v1020_v48 }
0x17ca   :  { %1030 = vrot.lane.b32.xlu0 %v1028_v34, %s2363_s27 }
0x183c   :  { %v1031_v51 = vpop.permute.xlu0 %1030 }
0x183d   :  { %v1033_v52 = vadd.f32 %v1031_v51, %v1023_v50 }
0x183f   :  { %2129 = vtanh.f32 %v1033_v52 }
0x1845   :  { %v2130_v53 = vpop.eup %2129 }
0x1846   :  { %1036 = vrot.lane.b32.xlu1 %v2130_v53, %s2362_s26 }
0x18b8   :  { %v1037_v54 = vpop.permute.xlu1 %1036 }
0x18b9   :  { %v1039_v55 = vmul.f32 %v1037_v54, %v1020_v48 }
0x18bb   :  { %1041 = vrot.lane.b32.xlu2 %v1039_v55, %s2363_s27 }
0x1915   :  { %v1042_v56 = vpop.permute.xlu2 %1041 }
0x1916   :  { %1976 = vmatmul.msk.f32.vlgmr.msrb.gmra.mxu2 %vm147_vm5, %v1042_v56 }
0x1999   :  { %v1062_v58 = vpop.f32.mrf.mxu2 }
0x199a   :  { %v1065_v62 = vadd.f32 %v1062_v58, %v706_v57 }
0x199c   :  { %v1066_v0 = vadd.f32 %v2617_v13, %v1065_v62 }
0x199e   :  { %2131 = vtanh.f32 %v1066_v0  ;;  %v1977_v10 = vmul.f32 -1.442695, %v1066_v0 }
0x19a0   :  { %2133 = vpow2.f32 %v1977_v10 }
0x19a4   :  { %v2132_v4 = vpop.eup %2131 }
0x19a5   :  { %1089 = vrot.lane.b32.xlu0 %v2132_v4, %s2362_s26 }
0x19a6   :  { %v2134_v11 = vpop.eup %2133 }
0x19a7   :  { %v1070_v12 = vadd.f32 1.0, %v2134_v11 }
0x19a9   :  { %2135 = vrcp.f32 %v1070_v12  ;;  %v1082_v2 = vand.u32 2147483648, %v1070_v12  ;;  %vm1076_vm6 = vweird.f32 %v1070_v12  ;;  %v1080_v17 = vand.u32 2147483647, %v1070_v12 }
0x19ab   :  { %v1083_v18 = vor.u32 1.1754944e-38, %v1082_v2  ;;  %vm1081_vm8 = vcmp.eq.f32.partialorder %v1080_v17, 8.507059e+37  ;;  %v2735_v17 = vld [vmem:[#allocation2 + $0x58] sm:$0xff] }
0x19ac   :  { %1314 = vmatpush.msrb.mxu2 %v2735_v17  ;;  %1378 = vmatpush.msrb.mxu3 %v2735_v17 }
0x19ad   :  { %1506 = vmatpush.msrb.mxu0 %v2735_v17 }
0x19af   :  { %v2136_v14 = vpop.eup %2135 }
0x19b0   :  { %v1072_v15 = vmul.f32 %v2136_v14, %v1070_v12  ;;  %vm1077_vm4 = vweird.f32 %v2136_v14 }
0x19b1   :  { %vm1078_vm7 = vmor %vm1076_vm6, %vm1077_vm4 }
0x19b2   :  { %v1073_v1 = vsub.f32 1.0, %v1072_v15 }
0x19b4   :  { %v1074_v63 = vmul.f32 %v2136_v14, %v1073_v1 }
0x19b6   :  { %v1075_v16 = vadd.f32 %v2136_v14, %v1074_v63 }
0x19b8   :  { %v1079_v6 = vsel %vm1078_vm7, %v2136_v14, %v1075_v16 }
0x19b9   :  { %v1084_v5 = vsel %vm1081_vm8, %v1083_v18, %v1079_v6  ;;  %v2737_v6 = vld [vmem:[#allocation2 + $0x50] sm:$0xff]  ;;  %v2741_v18 = vld [vmem:[#allocation2 + $0x48] sm:$0xff] }
0x19ba   :  { %v1087_v20 = vmul.f32 %v1084_v5, %v1033_v52  ;;  %1315 = vmatpush.msrb.mxu2 %v2737_v6  ;;  %1379 = vmatpush.msrb.mxu3 %v2737_v6 }
0x19bb   :  { %1507 = vmatpush.msrb.mxu0 %v2737_v6 }
0x19bc   :  { %1316 = vmatpush.msrb.mxu2 %v2741_v18  ;;  %1380 = vmatpush.msrb.mxu3 %v2741_v18 }
0x19bd   :  { %1508 = vmatpush.msrb.mxu0 %v2741_v18 }
0x1a17   :  { %v1090_v19 = vpop.permute.xlu0 %1089 }
0x1a18   :  { %v1092_v9 = vmul.f32 %v1090_v19, %v1084_v5  ;;  %v2746_v19 = vld [vmem:[#allocation2 + $0x40] sm:$0xff] }
0x1a19   :  { %1317 = vmatpush.msrb.mxu2 %v2746_v19  ;;  %1381 = vmatpush.msrb.mxu3 %v2746_v19 }
0x1a1a   :  { %1094 = vrot.lane.b32.xlu1 %v1092_v9, %s2363_s27  ;;  %1509 = vmatpush.msrb.mxu0 %v2746_v19 }
0x1a1b   :  { %1762 = vmatpush.msra.mxu3 %v2735_v17 }
0x1a1c   :  { %1634 = vmatpush.msra.mxu0 %v2735_v17 }
0x1a1d   :  { %1763 = vmatpush.msra.mxu3 %v2737_v6 }
0x1a1e   :  { %1635 = vmatpush.msra.mxu0 %v2737_v6 }
0x1a1f   :  { %1764 = vmatpush.msra.mxu3 %v2741_v18 }
0x1a20   :  { %1636 = vmatpush.msra.mxu0 %v2741_v18 }
0x1a21   :  { %1765 = vmatpush.msra.mxu3 %v2746_v19 }
0x1a22   :  { %1637 = vmatpush.msra.mxu0 %v2746_v19 }
0x1a8c   :  { %v1095_v21 = vpop.permute.xlu1 %1094 }
0x1a8d   :  { %v1097_v22 = vadd.f32 %v1095_v21, %v1087_v20  ;;  %v2779_v20 = vld [vmem:[%s2928_s4 + $0x2] ss:$0 sm:$0xff] }
0x1a8f   :  { %2137 = vtanh.f32 %v1097_v22 }
0x1a95   :  { %v2138_v23 = vpop.eup %2137 }
0x1a96   :  { %1100 = vrot.lane.b32.xlu2 %v2138_v23, %s2362_s26 }
0x1af0   :  { %v1101_v24 = vpop.permute.xlu2 %1100 }
0x1af1   :  { %v1103_v25 = vmul.f32 %v1101_v24, %v1084_v5 }
0x1af3   :  { %1105 = vrot.lane.b32.xlu0 %v1103_v25, %s2363_s27 }
0x1b65   :  { %v1106_v31 = vpop.permute.xlu0 %1105 }
0x1b66   :  { %1978 = vmatmul.msk.f32.vlgmr.msrb.gmra.mxu1 %vm147_vm5, %v1106_v31 }
0x1b6e   :  { %1986 = vmatmul.msk.f32.vlgmr.msra.gmra.mxu1 %vm147_vm5, %v2637_v60 }
0x1b76   :  { %1987 = vmatmul.msk.f32.gmra.mxu1 %vm147_vm5, %v2653_v32 }
0x1b7e   :  { %1988 = vmatmul.msk.f32.gmra.mxu1 %vm147_vm5, %v2666_v59 }
0x1b86   :  { %1989 = vmatmul.msk.f32.gmra.mxu1 %vm147_vm5, %v2679_v28 }
0x1b8e   :  { %1990 = vmatmul.msk.f32.gmra.mxu1 %vm147_vm5, %v1042_v56 }
0x1b96   :  { %1991 = vmatmul.msk.f32.gmra.mxu1 %vm147_vm5, %v1106_v31 }
0x1be3   :  { %v1126_v35 = vpop.f32.mrf.mxu1 }
0x1be4   :  { %v1129_v37 = vadd.f32 %v1126_v35, %v709_v33 }
0x1be6   :  { %v1130_v38 = vadd.f32 %v2617_v13, %v1129_v37  ;;  %v619_v13 = vadd.f32 %v2646_v61, %v2549_v8 }
0x1be8   :  { %2139 = vtanh.f32 %v1130_v38  ;;  %v1979_v32 = vmul.f32 -1.442695, %v1130_v38  ;;  %v620_v3 = vadd.f32 %v2227_v47, %v619_v13 }
0x1bea   :  { %2141 = vpow2.f32 %v1979_v32  ;;  %v1957_v54 = vmul.f32 -1.442695, %v620_v3 }
0x1beb   :  { %v1268_v21 = vpop.f32.mrf.mxu1 }
0x1bee   :  { %v2140_v60 = vpop.eup %2139 }
0x1bef   :  { %1153 = vrot.lane.b32.xlu1 %v2140_v60, %s2362_s26 }
0x1bf0   :  { %v2142_v39 = vpop.eup %2141 }
0x1bf1   :  { %v1134_v59 = vadd.f32 1.0, %v2142_v39 }
0x1bf3   :  { %2143 = vrcp.f32 %v1134_v59  ;;  %v1146_v44 = vand.u32 2147483648, %v1134_v59  ;;  %vm1140_vm10 = vweird.f32 %v1134_v59  ;;  %v1144_v45 = vand.u32 2147483647, %v1134_v59 }
0x1bf4   :  { %2145 = vtanh.f32 %v620_v3 }
0x1bf5   :  { %v1147_v36 = vor.u32 1.1754944e-38, %v1146_v44  ;;  %vm1145_vm12 = vcmp.eq.f32.partialorder %v1144_v45, 8.507059e+37 }
0x1bf9   :  { %v2144_v40 = vpop.eup %2143 }
0x1bfa   :  { %v1136_v28 = vmul.f32 %v2144_v40, %v1134_v59  ;;  %vm1141_vm9 = vweird.f32 %v2144_v40  ;;  %v2146_v51 = vpop.eup %2145 }
0x1bfb   :  { %vm1142_vm11 = vmor %vm1140_vm10, %vm1141_vm9 }
0x1bfc   :  { %v1137_v41 = vsub.f32 1.0, %v1136_v28 }
0x1bfe   :  { %v1138_v42 = vmul.f32 %v2144_v40, %v1137_v41 }
0x1c00   :  { %v1139_v43 = vadd.f32 %v2144_v40, %v1138_v42 }
0x1c02   :  { %v1143_v46 = vsel %vm1142_vm11, %v2144_v40, %v1139_v43 }
0x1c03   :  { %v1148_v34 = vsel %vm1145_vm12, %v1147_v36, %v1143_v46 }
0x1c04   :  { %v1151_v52 = vmul.f32 %v1148_v34, %v1097_v22 }
0x1c61   :  { %v1154_v48 = vpop.permute.xlu1 %1153 }
0x1c62   :  { %v1156_v50 = vmul.f32 %v1154_v48, %v1148_v34 }
0x1c64   :  { %1158 = vrot.lane.b32.xlu2 %v1156_v50, %s2363_s27 }
0x1c6c   :  { %643 = vrot.lane.b32.xlu2 %v2146_v51, %s2362_s26  ;;  %v1271_v51 = vpop.f32.mrf.mxu1 }
0x1cbe   :  { %v1159_v8 = vpop.permute.xlu2 %1158 }
0x1cbf   :  { %v2726_v61 = vadd.f32 %v1159_v8, %v1151_v52 }
0x1cc1   :  { %2147 = vtanh.f32 %v2726_v61 }
0x1cc2   :  { %2149 = vpow2.f32 %v1957_v54 }
0x1cc6   :  { %v644_v63 = vpop.permute.xlu2 %643 }
0x1cc7   :  { %v2148_v53 = vpop.eup %2147 }
0x1cc8   :  { %1164 = vrot.lane.b32.xlu0 %v2148_v53, %s2362_s26  ;;  %v2150_v55 = vpop.eup %2149 }
0x1cc9   :  { %v624_v56 = vadd.f32 1.0, %v2150_v55 }
0x1ccb   :  { %2151 = vrcp.f32 %v624_v56  ;;  %v636_v12 = vand.u32 2147483648, %v624_v56  ;;  %vm630_vm14 = vweird.f32 %v624_v56  ;;  %v634_v14 = vand.u32 2147483647, %v624_v56 }
0x1ccd   :  { %v637_v1 = vor.u32 1.1754944e-38, %v636_v12  ;;  %vm635_vm1 = vcmp.eq.f32.partialorder %v634_v14, 8.507059e+37 }
0x1cd1   :  { %v2152_v57 = vpop.eup %2151 }
0x1cd2   :  { %v626_v58 = vmul.f32 %v2152_v57, %v624_v56  ;;  %vm631_vm13 = vweird.f32 %v2152_v57 }
0x1cd3   :  { %vm632_vm15 = vmor %vm630_vm14, %vm631_vm13 }
0x1cd4   :  { %v627_v62 = vsub.f32 1.0, %v626_v58 }
0x1cd6   :  { %v628_v0 = vmul.f32 %v2152_v57, %v627_v62 }
0x1cd8   :  { %v629_v10 = vadd.f32 %v2152_v57, %v628_v0 }
0x1cda   :  { %v633_v15 = vsel %vm632_vm15, %v2152_v57, %v629_v10 }
0x1cdb   :  { %v2731_v16 = vsel %vm635_vm1, %v637_v1, %v633_v15 }
0x1cdc   :  { %v646_v2 = vmul.f32 %v644_v63, %v2731_v16  ;;  %v641_v25 = vmul.f32 %v2731_v16, %v2625_v49 }
0x1d3a   :  { %v1165_v4 = vpop.permute.xlu0 %1164 }
0x1d3b   :  { %v1167_v11 = vmul.f32 %v1165_v4, %v1148_v34 }
0x1d3d   :  { %1169 = vrot.lane.b32.xlu1 %v1167_v11, %s2363_s27 }
0x1d45   :  { %648 = vrot.lane.b32.xlu1 %v646_v2, %s2363_s27 }
0x1daf   :  { %v1170_v5 = vpop.permute.xlu1 %1169 }
0x1db0   :  { %1980 = vmatmul.msk.f32.vlgmr.msra.gmra.mxu2 %vm147_vm5, %v1170_v5  ;;  %1992 = vmatmul.msk.f32.gmra.mxu1 %vm147_vm5, %v1170_v5 }
0x1db1   :  { %1442 = vmatpush.msra.mxu2 %v2735_v17 }
0x1db3   :  { %1443 = vmatpush.msra.mxu2 %v2737_v6 }
0x1db5   :  { %1444 = vmatpush.msra.mxu2 %v2741_v18 }
0x1db7   :  { %1445 = vmatpush.msra.mxu2 %v2746_v19  ;;  %v649_v24 = vpop.permute.xlu1 %648 }
0x1db8   :  { %1318 = vmatmul.f32.vlgmr.msrb.gmra.mxu2 %v2361_v7  ;;  %v2784_v26 = vadd.f32 %v649_v24, %v641_v25  ;;  %v1274_v25 = vpop.f32.mrf.mxu1 }
0x1db9   :  { %1570 = vmatpush.msrb.mxu2 %v2735_v17 }
0x1dbb   :  { %1571 = vmatpush.msrb.mxu2 %v2737_v6 }
0x1dbd   :  { %1572 = vmatpush.msrb.mxu2 %v2741_v18 }
0x1dbf   :  { %1573 = vmatpush.msrb.mxu2 %v2746_v19 }
0x1e33   :  { %v2774_v9 = vpop.f32.mrf.mxu2 }
0x1e3b   :  { %v1319_v22 = vpop.f32.mrf.mxu2 }
0x1e3c   :  { %v1322_v23 = vadd.f32 %v1319_v22, %v1268_v21 }
0x1e3e   :  { %v1323_v7 = vadd.f32 %v2779_v20, %v1322_v23 }
0x1e40   :  { %2153 = vtanh.f32 %v1323_v7  ;;  %v1995_v30 = vmul.f32 -1.442695, %v1323_v7 }
0x1e41   :  { %2155 = vtanh.f32 %v2784_v26 }
0x1e42   :  { %2157 = vpow2.f32 %v1995_v30 }
0x1e46   :  { %v2154_v27 = vpop.eup %2153 }
0x1e47   :  { %1346 = vrot.lane.b32.xlu0 %v2154_v27, %s2362_s26  ;;  %v2156_v29 = vpop.eup %2155 }
0x1e48   :  { %v2158_v31 = vpop.eup %2157 }
0x1e49   :  { %v1327_v33 = vadd.f32 1.0, %v2158_v31 }
0x1e4b   :  { %2159 = vrcp.f32 %v1327_v33  ;;  %v1339_v32 = vand.u32 2147483648, %v1327_v33  ;;  %vm1333_vm0 = vweird.f32 %v1327_v33  ;;  %v1337_v39 = vand.u32 2147483647, %v1327_v33 }
0x1e4d   :  { %v1340_v40 = vor.u32 1.1754944e-38, %v1339_v32  ;;  %vm1338_vm4 = vcmp.eq.f32.partialorder %v1337_v39, 8.507059e+37 }
0x1e4f   :  { %654 = vrot.lane.b32.xlu0 %v2156_v29, %s2362_s26 }
0x1e51   :  { %v2160_v35 = vpop.eup %2159 }
0x1e52   :  { %v1329_v37 = vmul.f32 %v2160_v35, %v1327_v33  ;;  %vm1334_vm2 = vweird.f32 %v2160_v35 }
0x1e53   :  { %vm1335_vm3 = vmor %vm1333_vm0, %vm1334_vm2 }
0x1e54   :  { %v1330_v38 = vsub.f32 1.0, %v1329_v37 }
0x1e56   :  { %v1331_v60 = vmul.f32 %v2160_v35, %v1330_v38 }
0x1e58   :  { %v1332_v49 = vadd.f32 %v2160_v35, %v1331_v60 }
0x1e5a   :  { %v1336_v59 = vsel %vm1335_vm3, %v2160_v35, %v1332_v49 }
0x1e5b   :  { %v1341_v41 = vsel %vm1338_vm4, %v1340_v40, %v1336_v59 }
0x1e5c   :  { %v1344_v45 = vmul.f32 0.0, %v1341_v41 }
0x1eb9   :  { %v1347_v28 = vpop.permute.xlu0 %1346 }
0x1eba   :  { %v1349_v42 = vmul.f32 %v1347_v28, %v1341_v41 }
0x1ebc   :  { %1351 = vrot.lane.b32.xlu2 %v1349_v42, %s2363_s27 }
0x1ec1   :  { %v655_v43 = vpop.permute.xlu0 %654 }
0x1ec2   :  { %v657_v44 = vmul.f32 %v655_v43, %v2731_v16 }
0x1ec4   :  { %659 = vrot.lane.b32.xlu2 %v657_v44, %s2363_s27 }
0x1f16   :  { %v1352_v13 = vpop.permute.xlu2 %1351 }
0x1f17   :  { %v1354_v46 = vadd.f32 %v1352_v13, %v1344_v45 }
0x1f19   :  { %2161 = vtanh.f32 %v1354_v46 }
0x1f1e   :  { %v660_v36 = vpop.permute.xlu2 %659 }
0x1f1f   :  { %v2162_v47 = vpop.eup %2161  ;;  %662 = vst.msk [vmem:[#allocation8] sm:$0xff] %vm147_vm5, %v660_v36  ;;  %1965 = vmatmul.msk.f32.gmra.mxu3 %vm147_vm5, %v660_v36  ;;  %v1277_v36 = vpop.f32.mrf.mxu1 }
0x1f20   :  { %1357 = vrot.lane.b32.xlu1 %v2162_v47, %s2362_s26 }
0x1f92   :  { %v1358_v3 = vpop.permute.xlu1 %1357 }
0x1f93   :  { %v1360_v48 = vmul.f32 %v1358_v3, %v1341_v41 }
0x1f95   :  { %1362 = vrot.lane.b32.xlu0 %v1360_v48, %s2363_s27 }
0x1fa2   :  { %v2800_v50 = vpop.f32.mrf.mxu3 }
0x2007   :  { %v2796_v34 = vpop.permute.xlu0 %1362 }
0x2008   :  { %1996 = vmatmul.msk.f32.vlgmr.msrb.gmra.mxu3 %vm147_vm5, %v2796_v34 }
0x208b   :  { %v1383_v52 = vpop.f32.mrf.mxu3 }
0x208c   :  { %v1386_v8 = vadd.f32 %v1383_v52, %v1271_v51 }
0x208e   :  { %v1387_v53 = vadd.f32 %v2779_v20, %v1386_v8 }
0x2090   :  { %2163 = vtanh.f32 %v1387_v53  ;;  %v1997_v55 = vmul.f32 -1.442695, %v1387_v53 }
0x2092   :  { %2165 = vpow2.f32 %v1997_v55 }
0x2096   :  { %v2164_v54 = vpop.eup %2163 }
0x2097   :  { %1410 = vrot.lane.b32.xlu1 %v2164_v54, %s2362_s26 }
0x2098   :  { %v2166_v56 = vpop.eup %2165 }
0x2099   :  { %v1391_v57 = vadd.f32 1.0, %v2166_v56 }
0x209b   :  { %2167 = vrcp.f32 %v1391_v57  ;;  %v1403_v11 = vand.u32 2147483648, %v1391_v57  ;;  %vm1397_vm7 = vweird.f32 %v1391_v57  ;;  %v1401_v12 = vand.u32 2147483647, %v1391_v57 }
0x209d   :  { %v1404_v15 = vor.u32 1.1754944e-38, %v1403_v11  ;;  %vm1402_vm9 = vcmp.eq.f32.partialorder %v1401_v12, 8.507059e+37 }
0x20a1   :  { %v2168_v58 = vpop.eup %2167 }
0x20a2   :  { %v1393_v62 = vmul.f32 %v2168_v58, %v1391_v57  ;;  %vm1398_vm6 = vweird.f32 %v2168_v58 }
0x20a3   :  { %vm1399_vm8 = vmor %vm1397_vm7, %vm1398_vm6 }
0x20a4   :  { %v1394_v0 = vsub.f32 1.0, %v1393_v62 }
0x20a6   :  { %v1395_v4 = vmul.f32 %v2168_v58, %v1394_v0 }
0x20a8   :  { %v1396_v10 = vadd.f32 %v2168_v58, %v1395_v4 }
0x20aa   :  { %v1400_v14 = vsel %vm1399_vm8, %v2168_v58, %v1396_v10 }
0x20ab   :  { %v1405_v63 = vsel %vm1402_vm9, %v1404_v15, %v1400_v14 }
0x20ac   :  { %v1408_v2 = vmul.f32 %v1405_v63, %v1354_v46 }
0x2109   :  { %v1411_v1 = vpop.permute.xlu1 %1410 }
0x210a   :  { %v1413_v16 = vmul.f32 %v1411_v1, %v1405_v63 }
0x210c   :  { %1415 = vrot.lane.b32.xlu2 %v1413_v16, %s2363_s27 }
0x2166   :  { %v1416_v5 = vpop.permute.xlu2 %1415 }
0x2167   :  { %v1418_v21 = vadd.f32 %v1416_v5, %v1408_v2 }
0x2169   :  { %2169 = vtanh.f32 %v1418_v21 }
0x216f   :  { %v2170_v22 = vpop.eup %2169 }
0x2170   :  { %1421 = vrot.lane.b32.xlu0 %v2170_v22, %s2362_s26  ;;  %v1280_v22 = vpop.f32.mrf.mxu1 }
0x21e2   :  { %v1422_v23 = vpop.permute.xlu0 %1421 }
0x21e3   :  { %v1424_v7 = vmul.f32 %v1422_v23, %v1405_v63 }
0x21e5   :  { %1426 = vrot.lane.b32.xlu1 %v1424_v7, %s2363_s27 }
0x2257   :  { %v2807_v24 = vpop.permute.xlu1 %1426 }
0x2258   :  { %1998 = vmatmul.msk.f32.vlgmr.msra.gmra.mxu2 %vm147_vm5, %v2807_v24 }
0x2259   :  { %1698 = vmatpush.msra.mxu2 %v2735_v17 }
0x225b   :  { %1699 = vmatpush.msra.mxu2 %v2737_v6 }
0x225d   :  { %1700 = vmatpush.msra.mxu2 %v2741_v18 }
0x225f   :  { %1701 = vmatpush.msra.mxu2 %v2746_v19 }
0x22db   :  { %v1447_v27 = vpop.f32.mrf.mxu2 }
0x22dc   :  { %v1450_v29 = vadd.f32 %v1447_v27, %v1274_v25 }
0x22de   :  { %v1451_v30 = vadd.f32 %v2779_v20, %v1450_v29 }
0x22e0   :  { %2171 = vtanh.f32 %v1451_v30  ;;  %v1999_v33 = vmul.f32 -1.442695, %v1451_v30 }
0x22e2   :  { %2173 = vpow2.f32 %v1999_v33 }
0x22e6   :  { %v2172_v31 = vpop.eup %2171 }
0x22e7   :  { %1474 = vrot.lane.b32.xlu2 %v2172_v31, %s2362_s26 }
0x22e8   :  { %v2174_v35 = vpop.eup %2173 }
0x22e9   :  { %v1455_v37 = vadd.f32 1.0, %v2174_v35 }
0x22eb   :  { %2175 = vrcp.f32 %v1455_v37  ;;  %v1467_v19 = vand.u32 2147483648, %v1455_v37  ;;  %vm1461_vm11 = vweird.f32 %v1455_v37  ;;  %v1465_v49 = vand.u32 2147483647, %v1455_v37 }
0x22ed   :  { %v1468_v39 = vor.u32 1.1754944e-38, %v1467_v19  ;;  %vm1466_vm13 = vcmp.eq.f32.partialorder %v1465_v49, 8.507059e+37 }
0x22f1   :  { %v2176_v17 = vpop.eup %2175 }
0x22f2   :  { %v1457_v6 = vmul.f32 %v2176_v17, %v1455_v37  ;;  %vm1462_vm10 = vweird.f32 %v2176_v17 }
0x22f3   :  { %vm1463_vm12 = vmor %vm1461_vm11, %vm1462_vm10 }
0x22f4   :  { %v1458_v38 = vsub.f32 1.0, %v1457_v6 }
0x22f6   :  { %v1459_v18 = vmul.f32 %v2176_v17, %v1458_v38 }
0x22f8   :  { %v1460_v60 = vadd.f32 %v2176_v17, %v1459_v18 }
0x22fa   :  { %v1464_v32 = vsel %vm1463_vm12, %v2176_v17, %v1460_v60 }
0x22fb   :  { %v1469_v40 = vsel %vm1466_vm13, %v1468_v39, %v1464_v32 }
0x22fc   :  { %v1472_v41 = vmul.f32 %v1469_v40, %v1418_v21 }
0x2341   :  { %v1475_v59 = vpop.permute.xlu2 %1474 }
0x2342   :  { %v1477_v28 = vmul.f32 %v1475_v59, %v1469_v40 }
0x2344   :  { %1479 = vrot.lane.b32.xlu0 %v1477_v28, %s2363_s27 }
0x23b6   :  { %v1480_v42 = vpop.permute.xlu0 %1479 }
0x23b7   :  { %v1482_v43 = vadd.f32 %v1480_v42, %v1472_v41 }
0x23b9   :  { %2177 = vtanh.f32 %v1482_v43 }
0x23bf   :  { %v2178_v44 = vpop.eup %2177 }
0x23c0   :  { %1485 = vrot.lane.b32.xlu1 %v2178_v44, %s2362_s26  ;;  %v1824_v44 = vld [vmem:[#allocation5 + $0x18] sm:$0xff] }
0x2432   :  { %v1486_v45 = vpop.permute.xlu1 %1485 }
0x2433   :  { %v1488_v13 = vmul.f32 %v1486_v45, %v1469_v40  ;;  %v1823_v45 = vld [vmem:[#allocation5 + $0x10] sm:$0xff] }
0x2435   :  { %1490 = vrot.lane.b32.xlu2 %v1488_v13, %s2363_s27  ;;  %v1822_v13 = vld [vmem:[#allocation5 + $0x8] sm:$0xff] }
0x248f   :  { %v2820_v46 = vpop.permute.xlu2 %1490 }
0x2490   :  { %2000 = vmatmul.msk.f32.vlgmr.msrb.gmra.mxu0 %vm147_vm5, %v2820_v46 }
0x2491   :  { %1843 = vmatpush.msrb.mxu0 %v1824_v44 }
0x2493   :  { %1844 = vmatpush.msrb.mxu0 %v1823_v45 }
0x2495   :  { %1845 = vmatpush.msrb.mxu0 %v1822_v13 }
0x250d   :  { %v1511_v47 = vpop.f32.mrf.mxu0 }
0x250e   :  { %v1514_v3 = vadd.f32 %v1511_v47, %v1277_v36  ;;  %v1821_v36 = vld [vmem:[#allocation5] sm:$0xff] }
0x250f   :  { %1846 = vmatpush.msrb.mxu0 %v1821_v36 }
0x2510   :  { %v1515_v48 = vadd.f32 %v2779_v20, %v1514_v3  ;;  %v1283_v3 = vpop.f32.mrf.mxu1 }
0x2512   :  { %2179 = vtanh.f32 %v1515_v48  ;;  %v2001_v52 = vmul.f32 -1.442695, %v1515_v48 }
0x2514   :  { %2181 = vpow2.f32 %v2001_v52 }
0x2518   :  { %v2180_v51 = vpop.eup %2179 }
0x2519   :  { %1538 = vrot.lane.b32.xlu0 %v2180_v51, %s2362_s26 }
0x251a   :  { %v2182_v8 = vpop.eup %2181 }
0x251b   :  { %v1519_v53 = vadd.f32 1.0, %v2182_v8 }
0x251d   :  { %2183 = vrcp.f32 %v1519_v53  ;;  %v1531_v62 = vand.u32 2147483648, %v1519_v53  ;;  %vm1525_vm15 = vweird.f32 %v1519_v53  ;;  %v1529_v0 = vand.u32 2147483647, %v1519_v53 }
0x251f   :  { %v1532_v10 = vor.u32 1.1754944e-38, %v1531_v62  ;;  %vm1530_vm2 = vcmp.eq.f32.partialorder %v1529_v0, 8.507059e+37 }
0x2523   :  { %v2184_v54 = vpop.eup %2183 }
0x2524   :  { %v1521_v55 = vmul.f32 %v2184_v54, %v1519_v53  ;;  %vm1526_vm14 = vweird.f32 %v2184_v54 }
0x2525   :  { %vm1527_vm1 = vmor %vm1525_vm15, %vm1526_vm14 }
0x2526   :  { %v1522_v56 = vsub.f32 1.0, %v1521_v55 }
0x2528   :  { %v1523_v57 = vmul.f32 %v2184_v54, %v1522_v56 }
0x252a   :  { %v1524_v58 = vadd.f32 %v2184_v54, %v1523_v57 }
0x252c   :  { %v1528_v4 = vsel %vm1527_vm1, %v2184_v54, %v1524_v58 }
0x252d   :  { %v1533_v12 = vsel %vm1530_vm2, %v1532_v10, %v1528_v4 }
0x252e   :  { %v1536_v15 = vmul.f32 %v1533_v12, %v1482_v43 }
0x258b   :  { %v1539_v11 = vpop.permute.xlu0 %1538 }
0x258c   :  { %v1541_v14 = vmul.f32 %v1539_v11, %v1533_v12 }
0x258e   :  { %1543 = vrot.lane.b32.xlu1 %v1541_v14, %s2363_s27 }
0x2600   :  { %v1544_v1 = vpop.permute.xlu1 %1543 }
0x2601   :  { %v1546_v63 = vadd.f32 %v1544_v1, %v1536_v15 }
0x2603   :  { %2185 = vtanh.f32 %v1546_v63 }
0x2609   :  { %v2186_v16 = vpop.eup %2185 }
0x260a   :  { %1549 = vrot.lane.b32.xlu2 %v2186_v16, %s2362_s26 }
0x2664   :  { %v1550_v2 = vpop.permute.xlu2 %1549 }
0x2665   :  { %v1552_v5 = vmul.f32 %v1550_v2, %v1533_v12 }
0x2667   :  { %1554 = vrot.lane.b32.xlu0 %v1552_v5, %s2363_s27 }
0x26d9   :  { %v1555_v21 = vpop.permute.xlu0 %1554 }
0x26da   :  { %2002 = vmatmul.msk.f32.vlgmr.msrb.gmra.mxu2 %vm147_vm5, %v1555_v21 }
0x275d   :  { %v1575_v23 = vpop.f32.mrf.mxu2 }
0x275e   :  { %v1578_v7 = vadd.f32 %v1575_v23, %v1280_v22 }
0x2760   :  { %v1579_v25 = vadd.f32 %v2779_v20, %v1578_v7 }
0x2762   :  { %2187 = vtanh.f32 %v1579_v25  ;;  %v2003_v29 = vmul.f32 -1.442695, %v1579_v25 }
0x2764   :  { %2189 = vpow2.f32 %v2003_v29 }
0x2768   :  { %v2188_v27 = vpop.eup %2187 }
0x2769   :  { %1602 = vrot.lane.b32.xlu1 %v2188_v27, %s2362_s26 }
0x276a   :  { %v2190_v30 = vpop.eup %2189 }
0x276b   :  { %v1583_v31 = vadd.f32 1.0, %v2190_v30  ;;  %v1193_v30 = vadd.f32 %v2774_v9, %v2800_v50 }
0x276d   :  { %2191 = vrcp.f32 %v1583_v31  ;;  %v1595_v38 = vand.u32 2147483648, %v1583_v31  ;;  %vm1589_vm3 = vweird.f32 %v1583_v31  ;;  %v1593_v18 = vand.u32 2147483647, %v1583_v31 }
0x276f   :  { %v1596_v19 = vor.u32 1.1754944e-38, %v1595_v38  ;;  %vm1594_vm6 = vcmp.eq.f32.partialorder %v1593_v18, 8.507059e+37 }
0x2773   :  { %v2192_v33 = vpop.eup %2191 }
0x2774   :  { %v1585_v35 = vmul.f32 %v2192_v33, %v1583_v31  ;;  %vm1590_vm0 = vweird.f32 %v2192_v33  ;;  %v2228_v31 = vld [vmem:[%s2928_s4 + $0x1] ss:$0 sm:$0xff]  ;;  %s2364_s4 = smov 96  }
0x2775   :  { %vm1591_vm4 = vmor %vm1589_vm3, %vm1590_vm0 }
0x2776   :  { %v1586_v37 = vsub.f32 1.0, %v1585_v35 }
0x2778   :  { %v1587_v17 = vmul.f32 %v2192_v33, %v1586_v37 }
0x277a   :  { %v1588_v6 = vadd.f32 %v2192_v33, %v1587_v17 }
0x277c   :  { %v1592_v60 = vsel %vm1591_vm4, %v2192_v33, %v1588_v6  ;;  %v1194_v33 = vadd.f32 %v2228_v31, %v1193_v30 }
0x277d   :  { %v1597_v32 = vsel %vm1594_vm6, %v1596_v19, %v1592_v60 }
0x277e   :  { %v1600_v59 = vmul.f32 %v1597_v32, %v1546_v63  ;;  %v1981_v9 = vmul.f32 -1.442695, %v1194_v33 }
0x27db   :  { %v1603_v49 = vpop.permute.xlu1 %1602 }
0x27dc   :  { %v1605_v39 = vmul.f32 %v1603_v49, %v1597_v32 }
0x27de   :  { %1607 = vrot.lane.b32.xlu2 %v1605_v39, %s2363_s27  ;;  %v1286_v39 = vpop.f32.mrf.mxu1 }
0x2838   :  { %v1608_v40 = vpop.permute.xlu2 %1607 }
0x2839   :  { %v2833_v28 = vadd.f32 %v1608_v40, %v1600_v59 }
0x283b   :  { %2193 = vtanh.f32 %v2833_v28 }
0x2841   :  { %v2194_v41 = vpop.eup %2193 }
0x2842   :  { %1613 = vrot.lane.b32.xlu0 %v2194_v41, %s2362_s26 }
0x28b4   :  { %v1614_v42 = vpop.permute.xlu0 %1613 }
0x28b5   :  { %v1616_v43 = vmul.f32 %v1614_v42, %v1597_v32 }
0x28b7   :  { %1618 = vrot.lane.b32.xlu1 %v1616_v43, %s2363_s27 }
0x2929   :  { %v1619_v47 = vpop.permute.xlu1 %1618 }
0x292a   :  { %2004 = vmatmul.msk.f32.vlgmr.msra.gmra.mxu0 %vm147_vm5, %v1619_v47 }
0x2932   :  { %2010 = vmatmul.msk.f32.vlgmr.msrb.gmra.mxu0 %vm147_vm5, %v2796_v34  ;;  %v2851_v34 = vld [vmem:[%s2930_s6] ss:$0 sm:$0xff] }
0x293a   :  { %2011 = vmatmul.msk.f32.gmra.mxu0 %vm147_vm5, %v2807_v24 }
0x2942   :  { %2012 = vmatmul.msk.f32.gmra.mxu0 %vm147_vm5, %v2820_v46 }
0x294a   :  { %2013 = vmatmul.msk.f32.gmra.mxu0 %vm147_vm5, %v1555_v21 }
0x2952   :  { %2014 = vmatmul.msk.f32.gmra.mxu0 %vm147_vm5, %v1619_v47 }
0x29a7   :  { %v1639_v48 = vpop.f32.mrf.mxu0 }
0x29a8   :  { %v1642_v51 = vadd.f32 %v1639_v48, %v1283_v3 }
0x29aa   :  { %v1643_v52 = vadd.f32 %v2779_v20, %v1642_v51 }
0x29ac   :  { %2195 = vtanh.f32 %v1643_v52  ;;  %v2005_v4 = vmul.f32 -1.442695, %v1643_v52 }
0x29ae   :  { %2197 = vpow2.f32 %v2005_v4 }
0x29af   :  { %v1848_v8 = vpop.f32.mrf.mxu0 }
0x29b0   :  { %v1849_v24 = vadd.f32 %v2851_v34, %v1848_v8 }
0x29b2   :  { %v2196_v53 = vpop.eup %2195  ;;  %1872 = vst [vmem:[#allocation7] sm:$0xff] %v1849_v24 }
0x29b3   :  { %1666 = vrot.lane.b32.xlu2 %v2196_v53, %s2362_s26 }
0x29b4   :  { %v2198_v10 = vpop.eup %2197 }
0x29b5   :  { %v1647_v11 = vadd.f32 1.0, %v2198_v10 }
0x29b7   :  { %v1851_v46 = vpop.f32.mrf.mxu0  ;;  %2199 = vrcp.f32 %v1647_v11  ;;  %v1659_v16 = vand.u32 2147483648, %v1647_v11  ;;  %vm1653_vm8 = vweird.f32 %v1647_v11  ;;  %v1657_v2 = vand.u32 2147483647, %v1647_v11 }
0x29b8   :  { %v1852_v54 = vadd.f32 %v2851_v34, %v1851_v46 }
0x29b9   :  { %v1660_v21 = vor.u32 1.1754944e-38, %v1659_v16  ;;  %vm1658_vm10 = vcmp.eq.f32.partialorder %v1657_v2, 8.507059e+37 }
0x29ba   :  { %1873 = vst [vmem:[#allocation7 + $0x8] sm:$0xff] %v1852_v54 }
0x29bd   :  { %v2200_v12 = vpop.eup %2199 }
0x29be   :  { %v1649_v14 = vmul.f32 %v2200_v12, %v1647_v11  ;;  %vm1654_vm7 = vweird.f32 %v2200_v12 }
0x29bf   :  { %v1854_v55 = vpop.f32.mrf.mxu0  ;;  %vm1655_vm9 = vmor %vm1653_vm8, %vm1654_vm7 }
0x29c0   :  { %v1855_v56 = vadd.f32 %v2851_v34, %v1854_v55  ;;  %v1650_v15 = vsub.f32 1.0, %v1649_v14 }
0x29c2   :  { %1874 = vst [vmem:[#allocation7 + $0x10] sm:$0xff] %v1855_v56  ;;  %v1651_v1 = vmul.f32 %v2200_v12, %v1650_v15 }
0x29c4   :  { %v1652_v63 = vadd.f32 %v2200_v12, %v1651_v1 }
0x29c6   :  { %v1656_v5 = vsel %vm1655_vm9, %v2200_v12, %v1652_v63 }
0x29c7   :  { %v1857_v57 = vpop.f32.mrf.mxu0  ;;  %v1661_v23 = vsel %vm1658_vm10, %v1660_v21, %v1656_v5 }
0x29c8   :  { %v1858_v58 = vadd.f32 %v2851_v34, %v1857_v57  ;;  %v1664_v25 = vmul.f32 %v1661_v23, %v2833_v28 }
0x29ca   :  { %1875 = vst [vmem:[#allocation7 + $0x18] sm:$0xff] %v1858_v58 }
0x29cf   :  { %v1860_v62 = vpop.f32.mrf.mxu0 }
0x29d0   :  { %v1861_v0 = vadd.f32 %v2851_v34, %v1860_v62 }
0x29d2   :  { %1876 = vst [vmem:[#allocation7 + $0x20] sm:$0xff] %v1861_v0 }
0x2a0d   :  { %v1667_v22 = vpop.permute.xlu2 %1666 }
0x2a0e   :  { %v1669_v7 = vmul.f32 %v1667_v22, %v1661_v23 }
0x2a10   :  { %1671 = vrot.lane.b32.xlu0 %v1669_v7, %s2363_s27 }
0x2a82   :  { %v1672_v27 = vpop.permute.xlu0 %1671 }
0x2a83   :  { %v2861_v29 = vadd.f32 %v1672_v27, %v1664_v25 }
0x2a85   :  { %2201 = vtanh.f32 %v2861_v29 }
0x2a86   :  { %2203 = vtanh.f32 %v1194_v33 }
0x2a87   :  { %2205 = vpow2.f32 %v1981_v9 }
0x2a8b   :  { %v2202_v35 = vpop.eup %2201 }
0x2a8c   :  { %1677 = vrot.lane.b32.xlu1 %v2202_v35, %s2362_s26  ;;  %v2204_v37 = vpop.eup %2203 }
0x2a8d   :  { %v2206_v50 = vpop.eup %2205 }
0x2a8e   :  { %v1198_v18 = vadd.f32 1.0, %v2206_v50 }
0x2a90   :  { %2207 = vrcp.f32 %v1198_v18  ;;  %v1210_v45 = vand.u32 2147483648, %v1198_v18  ;;  %vm1204_vm12 = vweird.f32 %v1198_v18  ;;  %v1208_v13 = vand.u32 2147483647, %v1198_v18 }
0x2a92   :  { %v1211_v47 = vor.u32 1.1754944e-38, %v1210_v45  ;;  %vm1209_vm14 = vcmp.eq.f32.partialorder %v1208_v13, 8.507059e+37 }
0x2a94   :  { %1217 = vrot.lane.b32.xlu1 %v2204_v37, %s2362_s26 }
0x2a96   :  { %v2208_v19 = vpop.eup %2207 }
0x2a97   :  { %v1200_v32 = vmul.f32 %v2208_v19, %v1198_v18  ;;  %vm1205_vm11 = vweird.f32 %v2208_v19 }
0x2a98   :  { %vm1206_vm13 = vmor %vm1204_vm12, %vm1205_vm11 }
0x2a99   :  { %v1201_v28 = vsub.f32 1.0, %v1200_v32 }
0x2a9b   :  { %v1202_v42 = vmul.f32 %v2208_v19, %v1201_v28 }
0x2a9d   :  { %v1203_v43 = vadd.f32 %v2208_v19, %v1202_v42 }
0x2a9f   :  { %v1207_v36 = vsel %vm1206_vm13, %v2208_v19, %v1203_v43 }
0x2aa0   :  { %v1212_v48 = vsel %vm1209_vm14, %v1211_v47, %v1207_v36 }
0x2aa1   :  { %v1215_v12 = vmul.f32 %v1212_v48, %v2726_v61 }
0x2afe   :  { %v1678_v17 = vpop.permute.xlu1 %1677 }
0x2aff   :  { %v1680_v6 = vmul.f32 %v1678_v17, %v1661_v23 }
0x2b01   :  { %1682 = vrot.lane.b32.xlu2 %v1680_v6, %s2363_s27 }
0x2b06   :  { %v1218_v3 = vpop.permute.xlu1 %1217 }
0x2b07   :  { %v1220_v51 = vmul.f32 %v1218_v3, %v1212_v48 }
0x2b5b   :  { %v1683_v38 = vpop.permute.xlu2 %1682 }
0x2b5c   :  { %2006 = vmatmul.msk.f32.vlgmr.msra.gmra.mxu2 %vm147_vm5, %v1683_v38  ;;  %2015 = vmatmul.msk.f32.gmra.mxu0 %vm147_vm5, %v1683_v38 }
0x2bd9   :  { %v1863_v60 = vpop.f32.mrf.mxu0 }
0x2bda   :  { %v1864_v49 = vadd.f32 %v2851_v34, %v1863_v60 }
0x2bdc   :  { %1877 = vst [vmem:[#allocation7 + $0x28] sm:$0xff] %v1864_v49 }
0x2bdf   :  { %v1703_v59 = vpop.f32.mrf.mxu2 }
0x2be0   :  { %v1706_v40 = vadd.f32 %v1703_v59, %v1286_v39 }
0x2be2   :  { %v1707_v41 = vadd.f32 %v2779_v20, %v1706_v40 }
0x2be4   :  { %2209 = vtanh.f32 %v1707_v41  ;;  %v2007_v52 = vmul.f32 -1.442695, %v1707_v41 }
0x2be6   :  { %2211 = vpow2.f32 %v2007_v52 }
0x2bea   :  { %v2210_v44 = vpop.eup %2209 }
0x2beb   :  { %1730 = vrot.lane.b32.xlu0 %v2210_v44, %s2362_s26 }
0x2bec   :  { %v2212_v8 = vpop.eup %2211 }
0x2bed   :  { %v1711_v24 = vadd.f32 1.0, %v2212_v8 }
0x2bef   :  { %2213 = vrcp.f32 %v1711_v24  ;;  %v1723_v57 = vand.u32 2147483648, %v1711_v24  ;;  %vm1717_vm1 = vweird.f32 %v1711_v24  ;;  %v1721_v58 = vand.u32 2147483647, %v1711_v24 }
0x2bf1   :  { %v1724_v0 = vor.u32 1.1754944e-38, %v1723_v57  ;;  %vm1722_vm0 = vcmp.eq.f32.partialorder %v1721_v58, 8.507059e+37 }
0x2bf3   :  { %1222 = vrot.lane.b32.xlu0 %v1220_v51, %s2363_s27 }
0x2bf5   :  { %v2214_v53 = vpop.eup %2213 }
0x2bf6   :  { %v1713_v46 = vmul.f32 %v2214_v53, %v1711_v24  ;;  %vm1718_vm15 = vweird.f32 %v2214_v53 }
0x2bf7   :  { %vm1719_vm2 = vmor %vm1717_vm1, %vm1718_vm15 }
0x2bf8   :  { %v1714_v54 = vsub.f32 1.0, %v1713_v46 }
0x2bfa   :  { %v1715_v55 = vmul.f32 %v2214_v53, %v1714_v54 }
0x2bfc   :  { %v1716_v56 = vadd.f32 %v2214_v53, %v1715_v55 }
0x2bfe   :  { %v1720_v62 = vsel %vm1719_vm2, %v2214_v53, %v1716_v56 }
0x2bff   :  { %v1725_v10 = vsel %vm1722_vm0, %v1724_v0, %v1720_v62 }
0x2c00   :  { %v1728_v63 = vmul.f32 %v1725_v10, %v2861_v29 }
0x2c5d   :  { %v1731_v4 = vpop.permute.xlu0 %1730 }
0x2c5e   :  { %v1733_v11 = vmul.f32 %v1731_v4, %v1725_v10 }
0x2c60   :  { %1735 = vrot.lane.b32.xlu2 %v1733_v11, %s2363_s27 }
0x2c65   :  { %v1223_v14 = vpop.permute.xlu0 %1222 }
0x2c66   :  { %v2880_v15 = vadd.f32 %v1223_v14, %v1215_v12 }
0x2c68   :  { %2215 = vtanh.f32 %v2880_v15 }
0x2c6e   :  { %v2216_v1 = vpop.eup %2215 }
0x2c6f   :  { %1228 = vrot.lane.b32.xlu2 %v2216_v1, %s2362_s26 }
0x2cba   :  { %v1736_v16 = vpop.permute.xlu2 %1735 }
0x2cbb   :  { %v1738_v2 = vadd.f32 %v1736_v16, %v1728_v63 }
0x2cbd   :  { %2217 = vtanh.f32 %v1738_v2 }
0x2cc3   :  { %v2218_v5 = vpop.eup %2217 }
0x2cc4   :  { %1741 = vrot.lane.b32.xlu1 %v2218_v5, %s2362_s26 }
0x2cc9   :  { %v1229_v21 = vpop.permute.xlu2 %1228 }
0x2cca   :  { %v1231_v22 = vmul.f32 %v1229_v21, %v1212_v48 }
0x2ccc   :  { %1233 = vrot.lane.b32.xlu1 %v1231_v22, %s2363_s27 }
0x2d36   :  { %v1742_v61 = vpop.permute.xlu1 %1741 }
0x2d37   :  { %v1744_v23 = vmul.f32 %v1742_v61, %v1725_v10 }
0x2d39   :  { %1746 = vrot.lane.b32.xlu0 %v1744_v23, %s2363_s27 }
0x2d3e   :  { %v1234_v7 = vpop.permute.xlu1 %1233 }
0x2d3f   :  { %1237 = vst.msk [vmem:[#allocation8 + $0x8] sm:$0xff] %vm147_vm5, %v1234_v7  ;;  %1993 = vmatmul.msk.f32.gmra.mxu1 %vm147_vm5, %v1234_v7 }
0x2dab   :  { %v1747_v25 = vpop.permute.xlu0 %1746 }
0x2dac   :  { %2008 = vmatmul.msk.f32.vlgmr.msra.gmra.mxu3 %vm147_vm5, %v1747_v25  ;;  %2016 = vmatmul.msk.f32.gmra.mxu0 %vm147_vm5, %v1747_v25 }
0x2dbc   :  { %v1289_v30 = vpop.f32.mrf.mxu1 }
0x2e29   :  { %v1866_v27 = vpop.f32.mrf.mxu0 }
0x2e2a   :  { %v1867_v29 = vadd.f32 %v2851_v34, %v1866_v27 }
0x2e2c   :  { %1878 = vst [vmem:[#allocation7 + $0x30] sm:$0xff] %v1867_v29 }
0x2e2f   :  { %v1767_v31 = vpop.f32.mrf.mxu3 }
0x2e30   :  { %v1770_v33 = vadd.f32 %v1767_v31, %v1289_v30 }
0x2e32   :  { %v1771_v35 = vadd.f32 %v2779_v20, %v1770_v33 }
0x2e34   :  { %2219 = vtanh.f32 %v1771_v35  ;;  %v2009_v17 = vmul.f32 -1.442695, %v1771_v35 }
0x2e36   :  { %2221 = vpow2.f32 %v2009_v17 }
0x2e3a   :  { %v2220_v37 = vpop.eup %2219 }
0x2e3b   :  { %1794 = vrot.lane.b32.xlu2 %v2220_v37, %s2362_s26 }
0x2e3c   :  { %v2222_v6 = vpop.eup %2221 }
0x2e3d   :  { %v1775_v38 = vadd.f32 1.0, %v2222_v6 }
0x2e3f   :  { %2223 = vrcp.f32 %v1775_v38  ;;  %v1787_v49 = vand.u32 2147483648, %v1775_v38  ;;  %vm1781_vm4 = vweird.f32 %v1775_v38  ;;  %v1785_v32 = vand.u32 2147483647, %v1775_v38 }
0x2e41   :  { %v1788_v39 = vor.u32 1.1754944e-38, %v1787_v49  ;;  %vm1786_vm7 = vcmp.eq.f32.partialorder %v1785_v32, 8.507059e+37 }
0x2e45   :  { %v2224_v9 = vpop.eup %2223 }
0x2e46   :  { %v1777_v50 = vmul.f32 %v2224_v9, %v1775_v38  ;;  %vm1782_vm3 = vweird.f32 %v2224_v9 }
0x2e47   :  { %vm1783_vm6 = vmor %vm1781_vm4, %vm1782_vm3 }
0x2e48   :  { %v1778_v18 = vsub.f32 1.0, %v1777_v50 }
0x2e4a   :  { %v1779_v60 = vmul.f32 %v2224_v9, %v1778_v18 }
0x2e4c   :  { %v1780_v19 = vadd.f32 %v2224_v9, %v1779_v60 }
0x2e4e   :  { %v1784_v20 = vsel %vm1783_vm6, %v2224_v9, %v1780_v19 }
0x2e4f   :  { %v1789_v40 = vsel %vm1786_vm7, %v1788_v39, %v1784_v20 }
0x2e50   :  { %v1792_v41 = vmul.f32 %v1789_v40, %v1738_v2 }
0x2e95   :  { %v1795_v59 = vpop.permute.xlu2 %1794 }
0x2e96   :  { %v1797_v28 = vmul.f32 %v1795_v59, %v1789_v40 }
0x2e98   :  { %1799 = vrot.lane.b32.xlu0 %v1797_v28, %s2363_s27 }
0x2ea0   :  { %664 = vrot.lane.b32.xlu0 %v2784_v26, %s2364_s4 }
0x2f0a   :  { %v1800_v42 = vpop.permute.xlu0 %1799 }
0x2f0b   :  { %v1802_v43 = vadd.f32 %v1800_v42, %v1792_v41 }
0x2f0d   :  { %2225 = vtanh.f32 %v1802_v43 }
0x2f12   :  { %v665_v44 = vpop.permute.xlu0 %664 }
0x2f13   :  { %v2226_v45 = vpop.eup %2225  ;;  %667 = vst.msk [vmem:[#allocation10] sm:$0xff] %vm147_vm5, %v665_v44 }
0x2f14   :  { %1805 = vrot.lane.b32.xlu1 %v2226_v45, %s2362_s26  ;;  %s2366_s26 = smov [#allocation10]  }
0x2f1c   :  { %1239 = vrot.lane.b32.xlu1 %v2880_v15, %s2364_s4 }
0x2f86   :  { %v1806_v13 = vpop.permute.xlu1 %1805 }
0x2f87   :  { %v1808_v36 = vmul.f32 %v1806_v13, %v1789_v40 }
0x2f89   :  { %1810 = vrot.lane.b32.xlu2 %v1808_v36, %s2363_s27  ;;  %s1910_s27 = sshll.u32 %s2366_s26, 4  ;;  %s1911_s27 = int_to_ptr.vmem [resolvable:$true] %s1910_s27 }
0x2f8e   :  { %v1240_v47 = vpop.permute.xlu1 %1239 }
0x2f8f   :  { %1243 = vst.msk [vmem:[#allocation10 + $0x8] sm:$0xff] %vm147_vm5, %v1240_v47 }
0x2f91   :  { %1816 = vrot.lane.b32.xlu2 %v1802_v43, %s2364_s4 }
0x2fe3   :  { %v1811_v26 = vpop.permute.xlu2 %1810 }
0x2fe4   :  { %1814 = vst.msk [vmem:[#allocation8 + $0x10] sm:$0xff] %vm147_vm5, %v1811_v26  ;;  %2017 = vmatmul.msk.f32.gmra.mxu0 %vm147_vm5, %v1811_v26 }
0x2fe5   :  { %1905 = dma.vmem_to_hbm [thread:$0]  %s1898_s24, 384, %s1900_s28, [#allocation9], %s2358_s17, %s2358_s17, %s2359_s18  }
0x2feb   :  { %v1817_v3 = vpop.permute.xlu2 %1816 }
0x2fec   :  { %1820 = vst.msk [vmem:[#allocation10 + $0x10] sm:$0xff] %vm147_vm5, %v1817_v3 }
0x2fed   :  { %1918 = dma.vmem_to_hbm [thread:$0]  %s1911_s27, 384, %s1913_s10, [#allocation9], %s2358_s17, %s2358_s17, %s2359_s18  }
0x3061   :  { %v1869_v48 = vpop.f32.mrf.mxu0 }
0x3062   :  { %v1870_v51 = vadd.f32 %v2851_v34, %v1869_v48 }
0x3064   :  { %1879 = vst [vmem:[#allocation7 + $0x38] sm:$0xff] %v1870_v51 }
0x3065   :  { %1892 = dma.vmem_to_hbm [thread:$0]  %s1885_s11, 1024, %s1887_s14, [#allocation4], %s2358_s17, %s2358_s17, %s2359_s18  }
0x3066   :  { %2353 = dma.done.wait [#allocation4], 1024  }
0x3067   :  { %2354 = vsyncadd [#allocation4], 4294966272 }
0x3068   :  { %2355 = dma.done.wait [#allocation9], 768  }
0x3069   :  { %2356 = vsyncadd [#allocation9], 4294966528 }
0x306a   :  { %1931 = vsyncpa [#allocation3], 1 }
0x306b   :  { %1932 = vsyncpa [#allocation6], 1 }
0x306c   :  { %1933 = vsyncpa [#allocation4], 1 }
0x306d   :  { %1934 = vsyncpa [#allocation9], 1 }

</bundles_post_ra>
